<compile_context>
chip_gen: v5e
topology: v5e:2x2
jax: 0.10.0
libtpu: 0.0.40
codegen_flags: <defaults>
</compile_context>

<pallas_src>
import jax
import jax.numpy as jnp
from jax import lax
from jax.experimental import pallas as pl
from jax.experimental.pallas import tpu as pltpu


def _dual_attention_ae_kernel(
    x_ref, pf_ref, wp_ref,
    w1_ref, b1_ref, w2_ref, b2_ref,
    w3_ref, b3_ref, w4_ref, b4_ref,
    rec_ref, pam_ref,
):
    x = x_ref[...]                                        # (TB, D) compute dtype

    # ---- pairwise attention (softmax over features, math in f32) ----
    scores = jnp.dot(x, wp_ref[...],
                     preferred_element_type=jnp.float32)  # (TB, D) f32
    scores = scores - jnp.max(scores, axis=-1, keepdims=True)
    e = jnp.exp(scores)
    coeffs = e * pl.reciprocal(jnp.sum(e, axis=-1, keepdims=True))  # (TB, D) f32

    # pam = coeffs^T @ coeffs, reduced over the whole batch -> accumulate into
    # the resident output block across the batch grid axis.
    @pl.when(pl.program_id(0) == 0)
    def _():
        pam_ref[...] = jnp.zeros_like(pam_ref)

    c = coeffs.astype(x.dtype)
    pam_ref[...] += lax.dot_general(
        c, c,
        dimension_numbers=(((0,), (0,)), ((), ())),       # contract batch axis;
        preferred_element_type=jnp.float32)               # transpose folded into MXU

    # ---- per-feature attention (pf precomputed outside) + encoder/decoder ----
    attended = x * pf_ref[...]                            # (TB, D)

    h1 = jnp.maximum(
        jnp.dot(attended, w1_ref[...], preferred_element_type=jnp.float32)
        + b1_ref[...], 0.0)                               # (TB, H) f32
    h2 = jnp.maximum(
        jnp.dot(h1.astype(w2_ref.dtype), w2_ref[...],
                preferred_element_type=jnp.float32)
        + b2_ref[...], 0.0)                               # (TB, H//2)
    h3 = jnp.maximum(
        jnp.dot(h2.astype(w3_ref.dtype), w3_ref[...],
                preferred_element_type=jnp.float32)
        + b3_ref[...], 0.0)                               # (TB, H)
    logits = (jnp.dot(h3.astype(w4_ref.dtype), w4_ref[...],
                      preferred_element_type=jnp.float32)
              + b4_ref[...])                              # (TB, D) f32
    rec_ref[...] = jax.nn.sigmoid(logits)                 # EUP logistic


def dual_attention_autoencoder(x, params, *, batch_tile=128,
                               compute_dtype=jnp.float32):
    """x: (B, D) float32. params: dict of weights (see init_params)."""
    B, D = x.shape
    H = params["w1"].shape[1]
    Hh = params["w2"].shape[1]
    assert B % batch_tile == 0, "batch must be divisible by batch_tile"
    nb = B // batch_tile

    # Per-feature softmax depends only on parameters -> hoist out of the kernel.
    pf = jax.nn.softmax(params["w_feat"], axis=-1)        # (1, D) f32

    cd = compute_dtype
    x_c = x.astype(cd)
    pf_c = pf.astype(cd)
    wp = params["w_pair"].astype(cd)
    w1 = params["w1"].astype(cd)
    w2 = params["w2"].astype(cd)
    w3 = params["w3"].astype(cd)
    w4 = params["w4"].astype(cd)
    b1, b2, b3, b4 = params["b1"], params["b2"], params["b3"], params["b4"]

    def resident(shape):
        # Whole-array block, same tile at every grid step -> stays in VMEM.
        return pl.BlockSpec(shape, lambda i: (0, 0))

    in_specs = [
        pl.BlockSpec((batch_tile, D), lambda i: (i, 0)),  # x
        resident((1, D)),                                 # pf
        resident((D, D)),                                 # w_pair
        resident((D, H)), resident((1, H)),               # w1, b1
        resident((H, Hh)), resident((1, Hh)),             # w2, b2
        resident((Hh, H)), resident((1, H)),              # w3, b3
        resident((H, D)), resident((1, D)),               # w4, b4
    ]
    out_specs = (
        pl.BlockSpec((batch_tile, D), lambda i: (i, 0)),  # reconstructed
        pl.BlockSpec((D, D), lambda i: (0, 0)),           # pam accumulator
    )
    out_shapes = (
        jax.ShapeDtypeStruct((B, D), jnp.float32),
        jax.ShapeDtypeStruct((D, D), jnp.float32),
    )

    rec, pam = pl.pallas_call(
        _dual_attention_ae_kernel,
        grid=(nb,),
        out_shape=out_shapes,
        in_specs=in_specs,
        out_specs=out_specs,
        compiler_params=pltpu.CompilerParams(
            # Batch axis carries the pam reduction -> must stay "arbitrary".
            dimension_semantics=("arbitrary",)),
    )(x_c, pf_c, wp, w1, b1, w2, b2, w3, b3, w4, b4)

    return rec, pam, pf[0]   # per-feature coeffs as a (D,) vector, like PyTorch


def init_params(key, input_dim, hidden_dim):
    """Deterministic, in-script parameter init mirroring the module's shapes."""
    keys = jax.random.split(key, 10)
    D, H = input_dim, hidden_dim
    Hh = H // 2

    def linear(kw, kb, fan_in, fan_out):
        bound = 1.0 / jnp.sqrt(fan_in)
        w = jax.random.uniform(kw, (fan_in, fan_out), jnp.float32, -bound, bound)
        b = jax.random.uniform(kb, (1, fan_out), jnp.float32, -bound, bound)
        return w, b

    # Xavier-uniform for the pairwise attention weights.
    xb = jnp.sqrt(6.0 / (D + D))
    w_pair = jax.random.uniform(keys[0], (D, D), jnp.float32, -xb, xb)
    # Uniform(0, 1) for per-feature attention weights (kept 2D as (1, D)).
    w_feat = jax.random.uniform(keys[1], (1, D), jnp.float32, 0.0, 1.0)

    w1, b1 = linear(keys[2], keys[3], D, H)
    w2, b2 = linear(keys[4], keys[5], H, Hh)
    w3, b3 = linear(keys[6], keys[7], Hh, H)
    w4, b4 = linear(keys[8], keys[9], H, D)

    return dict(w_pair=w_pair, w_feat=w_feat,
                w1=w1, b1=b1, w2=w2, b2=b2,
                w3=w3, b3=b3, w4=w4, b4=b4)


def _reference(x, p):
    """Pure-JAX reference of the PyTorch forward."""
    scores = x @ p["w_pair"]
    coeffs = jax.nn.softmax(scores, axis=-1)
    pam = coeffs.T @ coeffs
    pf = jax.nn.softmax(p["w_feat"][0], axis=0)
    att = x * pf
    h = jax.nn.relu(att @ p["w1"] + p["b1"])
    h = jax.nn.relu(h @ p["w2"] + p["b2"])
    h = jax.nn.relu(h @ p["w3"] + p["b3"])
    rec = jax.nn.sigmoid(h @ p["w4"] + p["b4"])
    return rec, pam, pf


if __name__ == "__main__":
    # Lane-aligned small shapes: 2 batch tiles of 128 exercise the pipelined
    # grid + pam accumulator; D=128 keeps outputs lane-dense (no masked stores).
    B, D, H = 256, 128, 64   # batch, input_dim, hidden_dim

    key = jax.random.PRNGKey(0)
    k_x, k_p = jax.random.split(key)
    x = jax.random.uniform(k_x, (B, D), jnp.float32)
    params = init_params(k_p, D, H)

    # ---- f32 path (strict correctness check) ----
    rec, pam, pf = dual_attention_autoencoder(x, params, batch_tile=128)
    jax.block_until_ready((rec, pam, pf))

    rec_r, pam_r, pf_r = _reference(x, params)
    assert rec.shape == (B, D) and pam.shape == (D, D) and pf.shape == (D,)
    assert jnp.allclose(rec, rec_r, atol=2e-5), "reconstructed mismatch (f32)"
    assert jnp.allclose(pam, pam_r, atol=2e-5), "pairwise attention matrix mismatch (f32)"
    assert jnp.allclose(pf, pf_r, atol=1e-6), "per-feature coeffs mismatch"

    # ---- bf16 MXU path (v6e/v7x throughput lever), f32 accumulation ----
    rec_b, pam_b, pf_b = dual_attention_autoencoder(
        x, params, batch_tile=128, compute_dtype=jnp.bfloat16)
    jax.block_until_ready((rec_b, pam_b, pf_b))
    assert jnp.allclose(rec_b, rec_r, atol=5e-2), "reconstructed mismatch (bf16)"
    assert jnp.allclose(pam_b, pam_r, atol=5e-2), "pairwise attention matrix mismatch (bf16)"
    assert jnp.allclose(pf_b, pf_r, atol=1e-6), "per-feature coeffs mismatch (bf16)"

    print("KERNEL_OK")
</pallas_src>

<mosaic_0001>
module attributes {stable_mosaic.version = 11 : i64} {
  func.func @_dual_attention_ae_kernel(%arg0: i32, %arg1: memref<128x128xf32, #tpu.memory_space<vmem>>, %arg2: memref<1x128xf32, #tpu.memory_space<vmem>>, %arg3: memref<128x128xf32, #tpu.memory_space<vmem>>, %arg4: memref<128x64xf32, #tpu.memory_space<vmem>>, %arg5: memref<1x64xf32, #tpu.memory_space<vmem>>, %arg6: memref<64x32xf32, #tpu.memory_space<vmem>>, %arg7: memref<1x32xf32, #tpu.memory_space<vmem>>, %arg8: memref<32x64xf32, #tpu.memory_space<vmem>>, %arg9: memref<1x64xf32, #tpu.memory_space<vmem>>, %arg10: memref<64x128xf32, #tpu.memory_space<vmem>>, %arg11: memref<1x128xf32, #tpu.memory_space<vmem>>, %arg12: memref<128x128xf32, #tpu.memory_space<vmem>>, %arg13: memref<128x128xf32, #tpu.memory_space<vmem>>) attributes {dimension_semantics = [#tpu.dimension_semantics<arbitrary>], iteration_bounds = array<i64: 2>, scalar_prefetch = 0 : i64, scratch_operands = 0 : i64, tpu.core_type = #tpu.core_type<tc>, window_params = [{transform_indices = @transform_0, window_bounds = array<i64: 128, 128>}, {pipeline_mode = #tpu.pipeline_mode<synchronous>, transform_indices = @transform_1, window_bounds = array<i64: 1, 128>}, {pipeline_mode = #tpu.pipeline_mode<synchronous>, transform_indices = @transform_2, window_bounds = array<i64: 128, 128>}, {pipeline_mode = #tpu.pipeline_mode<synchronous>, transform_indices = @transform_3, window_bounds = array<i64: 128, 64>}, {pipeline_mode = #tpu.pipeline_mode<synchronous>, transform_indices = @transform_4, window_bounds = array<i64: 1, 64>}, {pipeline_mode = #tpu.pipeline_mode<synchronous>, transform_indices = @transform_5, window_bounds = array<i64: 64, 32>}, {pipeline_mode = #tpu.pipeline_mode<synchronous>, transform_indices = @transform_6, window_bounds = array<i64: 1, 32>}, {pipeline_mode = #tpu.pipeline_mode<synchronous>, transform_indices = @transform_7, window_bounds = array<i64: 32, 64>}, {pipeline_mode = #tpu.pipeline_mode<synchronous>, transform_indices = @transform_8, window_bounds = array<i64: 1, 64>}, {pipeline_mode = #tpu.pipeline_mode<synchronous>, transform_indices = @transform_9, window_bounds = array<i64: 64, 128>}, {pipeline_mode = #tpu.pipeline_mode<synchronous>, transform_indices = @transform_10, window_bounds = array<i64: 1, 128>}, {transform_indices = @transform_11, window_bounds = array<i64: 128, 128>}, {pipeline_mode = #tpu.pipeline_mode<synchronous>, transform_indices = @transform_12, window_bounds = array<i64: 128, 128>}]} {
    %c0 = arith.constant 0 : index
    %c0_0 = arith.constant 0 : index
    %0 = vector.load %arg1[%c0, %c0_0] : memref<128x128xf32, #tpu.memory_space<vmem>>, vector<128x128xf32>
    %c0_1 = arith.constant 0 : index
    %c0_2 = arith.constant 0 : index
    %1 = vector.load %arg3[%c0_1, %c0_2] : memref<128x128xf32, #tpu.memory_space<vmem>>, vector<128x128xf32>
    %cst = arith.constant dense<0.000000e+00> : vector<128x128xf32>
    %2 = tpu.matmul %0, %1, %cst {dimension_numbers = #tpu.dot_dimension_numbers<[1], [0], [0], [1], [0, 0, 1, 1], [], []>} : vector<128x128xf32>, vector<128x128xf32>, vector<128x128xf32> -> vector<128x128xf32>
    %cst_3 = arith.constant dense<0xFF800000> : vector<128xf32>
    %3 = vector.multi_reduction <maximumf>, %2, %cst_3 [1] : vector<128x128xf32> to vector<128xf32>
    %4 = vector.shape_cast %3 : vector<128xf32> to vector<128x1xf32>
    %5 = vector.broadcast %4 : vector<128x1xf32> to vector<128x128xf32>
    %6 = arith.subf %2, %5 : vector<128x128xf32>
    %7 = math.exp %6 : vector<128x128xf32>
    %cst_4 = arith.constant dense<0.000000e+00> : vector<128xf32>
    %8 = vector.multi_reduction <add>, %7, %cst_4 [1] : vector<128x128xf32> to vector<128xf32>
    %9 = vector.shape_cast %8 : vector<128xf32> to vector<128x1xf32>
    %10 = tpu.reciprocal %9 : vector<128x1xf32> -> vector<128x1xf32>
    %11 = vector.broadcast %10 : vector<128x1xf32> to vector<128x128xf32>
    %12 = arith.mulf %7, %11 : vector<128x128xf32>
    %c0_i32 = arith.constant 0 : i32
    %13 = arith.cmpi eq, %arg0, %c0_i32 : i32
    %14 = arith.extui %13 : i1 to i32
    %c0_i32_5 = arith.constant 0 : i32
    %15 = arith.cmpi ne, %14, %c0_i32_5 : i32
    scf.if %15 {
      %cst_39 = arith.constant 0.000000e+00 : f32
      %55 = vector.broadcast %cst_39 : f32 to vector<128x128xf32>
      %c0_40 = arith.constant 0 : index
      %c0_41 = arith.constant 0 : index
      %56 = vector.load %arg13[%c0_40, %c0_41] : memref<128x128xf32, #tpu.memory_space<vmem>>, vector<128x128xf32>
      tpu.vector_store %arg13[%c0_40, %c0_41], %55 {strides = array<i32>} : memref<128x128xf32, #tpu.memory_space<vmem>>, vector<128x128xf32>,
    } else {
    }
    %c0_6 = arith.constant 0 : index
    %c0_7 = arith.constant 0 : index
    %16 = vector.load %arg13[%c0_6, %c0_7] : memref<128x128xf32, #tpu.memory_space<vmem>>, vector<128x128xf32>
    %cst_8 = arith.constant dense<0.000000e+00> : vector<128x128xf32>
    %17 = tpu.matmul %12, %12, %cst_8 {dimension_numbers = #tpu.dot_dimension_numbers<[0], [0], [1], [1], [0, 1, 1, 1], [], []>} : vector<128x128xf32>, vector<128x128xf32>, vector<128x128xf32> -> vector<128x128xf32>
    %18 = arith.addf %16, %17 : vector<128x128xf32>
    %c0_9 = arith.constant 0 : index
    %c0_10 = arith.constant 0 : index
    %19 = vector.load %arg13[%c0_9, %c0_10] : memref<128x128xf32, #tpu.memory_space<vmem>>, vector<128x128xf32>
    tpu.vector_store %arg13[%c0_9, %c0_10], %18 {strides = array<i32>} : memref<128x128xf32, #tpu.memory_space<vmem>>, vector<128x128xf32>,
    %c0_11 = arith.constant 0 : index
    %c0_12 = arith.constant 0 : index
    %20 = vector.load %arg2[%c0_11, %c0_12] : memref<1x128xf32, #tpu.memory_space<vmem>>, vector<1x128xf32>
    %21 = vector.broadcast %20 : vector<1x128xf32> to vector<128x128xf32>
    %22 = arith.mulf %0, %21 : vector<128x128xf32>
    %c0_13 = arith.constant 0 : index
    %c0_14 = arith.constant 0 : index
    %23 = vector.load %arg4[%c0_13, %c0_14] : memref<128x64xf32, #tpu.memory_space<vmem>>, vector<128x64xf32>
    %cst_15 = arith.constant dense<0.000000e+00> : vector<128x64xf32>
    %24 = tpu.matmul %22, %23, %cst_15 {dimension_numbers = #tpu.dot_dimension_numbers<[1], [0], [0], [1], [0, 0, 1, 1], [], []>} : vector<128x128xf32>, vector<128x64xf32>, vector<128x64xf32> -> vector<128x64xf32>
    %c0_16 = arith.constant 0 : index
    %c0_17 = arith.constant 0 : index
    %25 = vector.load %arg5[%c0_16, %c0_17] : memref<1x64xf32, #tpu.memory_space<vmem>>, vector<1x64xf32>
    %26 = vector.broadcast %25 : vector<1x64xf32> to vector<128x64xf32>
    %27 = arith.addf %24, %26 : vector<128x64xf32>
    %cst_18 = arith.constant 0.000000e+00 : f32
    %28 = vector.broadcast %cst_18 : f32 to vector<128x64xf32>
    %29 = arith.maximumf %27, %28 : vector<128x64xf32>
    %c0_19 = arith.constant 0 : index
    %c0_20 = arith.constant 0 : index
    %30 = vector.load %arg6[%c0_19, %c0_20] : memref<64x32xf32, #tpu.memory_space<vmem>>, vector<64x32xf32>
    %cst_21 = arith.constant dense<0.000000e+00> : vector<128x32xf32>
    %31 = tpu.matmul %29, %30, %cst_21 {dimension_numbers = #tpu.dot_dimension_numbers<[1], [0], [0], [1], [0, 0, 1, 1], [], []>} : vector<128x64xf32>, vector<64x32xf32>, vector<128x32xf32> -> vector<128x32xf32>
    %c0_22 = arith.constant 0 : index
    %c0_23 = arith.constant 0 : index
    %32 = vector.load %arg7[%c0_22, %c0_23] : memref<1x32xf32, #tpu.memory_space<vmem>>, vector<1x32xf32>
    %33 = vector.broadcast %32 : vector<1x32xf32> to vector<128x32xf32>
    %34 = arith.addf %31, %33 : vector<128x32xf32>
    %cst_24 = arith.constant 0.000000e+00 : f32
    %35 = vector.broadcast %cst_24 : f32 to vector<128x32xf32>
    %36 = arith.maximumf %34, %35 : vector<128x32xf32>
    %c0_25 = arith.constant 0 : index
    %c0_26 = arith.constant 0 : index
    %37 = vector.load %arg8[%c0_25, %c0_26] : memref<32x64xf32, #tpu.memory_space<vmem>>, vector<32x64xf32>
    %cst_27 = arith.constant dense<0.000000e+00> : vector<128x64xf32>
    %38 = tpu.matmul %36, %37, %cst_27 {dimension_numbers = #tpu.dot_dimension_numbers<[1], [0], [0], [1], [0, 0, 1, 1], [], []>} : vector<128x32xf32>, vector<32x64xf32>, vector<128x64xf32> -> vector<128x64xf32>
    %c0_28 = arith.constant 0 : index
    %c0_29 = arith.constant 0 : index
    %39 = vector.load %arg9[%c0_28, %c0_29] : memref<1x64xf32, #tpu.memory_space<vmem>>, vector<1x64xf32>
    %40 = vector.broadcast %39 : vector<1x64xf32> to vector<128x64xf32>
    %41 = arith.addf %38, %40 : vector<128x64xf32>
    %cst_30 = arith.constant 0.000000e+00 : f32
    %42 = vector.broadcast %cst_30 : f32 to vector<128x64xf32>
    %43 = arith.maximumf %41, %42 : vector<128x64xf32>
    %c0_31 = arith.constant 0 : index
    %c0_32 = arith.constant 0 : index
    %44 = vector.load %arg10[%c0_31, %c0_32] : memref<64x128xf32, #tpu.memory_space<vmem>>, vector<64x128xf32>
    %cst_33 = arith.constant dense<0.000000e+00> : vector<128x128xf32>
    %45 = tpu.matmul %43, %44, %cst_33 {dimension_numbers = #tpu.dot_dimension_numbers<[1], [0], [0], [1], [0, 0, 1, 1], [], []>} : vector<128x64xf32>, vector<64x128xf32>, vector<128x128xf32> -> vector<128x128xf32>
    %c0_34 = arith.constant 0 : index
    %c0_35 = arith.constant 0 : index
    %46 = vector.load %arg11[%c0_34, %c0_35] : memref<1x128xf32, #tpu.memory_space<vmem>>, vector<1x128xf32>
    %47 = vector.broadcast %46 : vector<1x128xf32> to vector<128x128xf32>
    %48 = arith.addf %45, %47 : vector<128x128xf32>
    %49 = arith.negf %48 : vector<128x128xf32>
    %50 = math.exp %49 : vector<128x128xf32>
    %cst_36 = arith.constant 1.000000e+00 : f32
    %51 = vector.broadcast %cst_36 : f32 to vector<128x128xf32>
    %52 = arith.addf %51, %50 : vector<128x128xf32>
    %53 = arith.divf %51, %52 : vector<128x128xf32>
    %c0_37 = arith.constant 0 : index
    %c0_38 = arith.constant 0 : index
    %54 = vector.load %arg12[%c0_37, %c0_38] : memref<128x128xf32, #tpu.memory_space<vmem>>, vector<128x128xf32>
    tpu.vector_store %arg12[%c0_37, %c0_38], %53 {strides = array<i32>} : memref<128x128xf32, #tpu.memory_space<vmem>>, vector<128x128xf32>,
    return
  }
  func.func @transform_0(%arg0: i32) -> (i32, i32) {
    %c0_i32 = arith.constant 0 : i32
    %c0_i32_0 = arith.constant 0 : i32
    return %arg0, %c0_i32 : i32, i32
  }
  func.func @transform_1(%arg0: i32) -> (i32, i32) {
    %c0_i32 = arith.constant 0 : i32
    %c0_i32_0 = arith.constant 0 : i32
    %c0_i32_1 = arith.constant 0 : i32
    return %c0_i32, %c0_i32_0 : i32, i32
  }
  func.func @transform_2(%arg0: i32) -> (i32, i32) {
    %c0_i32 = arith.constant 0 : i32
    %c0_i32_0 = arith.constant 0 : i32
    %c0_i32_1 = arith.constant 0 : i32
    return %c0_i32, %c0_i32_0 : i32, i32
  }
  func.func @transform_3(%arg0: i32) -> (i32, i32) {
    %c0_i32 = arith.constant 0 : i32
    %c0_i32_0 = arith.constant 0 : i32
    %c0_i32_1 = arith.constant 0 : i32
    return %c0_i32, %c0_i32_0 : i32, i32
  }
  func.func @transform_4(%arg0: i32) -> (i32, i32) {
    %c0_i32 = arith.constant 0 : i32
    %c0_i32_0 = arith.constant 0 : i32
    %c0_i32_1 = arith.constant 0 : i32
    return %c0_i32, %c0_i32_0 : i32, i32
  }
  func.func @transform_5(%arg0: i32) -> (i32, i32) {
    %c0_i32 = arith.constant 0 : i32
    %c0_i32_0 = arith.constant 0 : i32
    %c0_i32_1 = arith.constant 0 : i32
    return %c0_i32, %c0_i32_0 : i32, i32
  }
  func.func @transform_6(%arg0: i32) -> (i32, i32) {
    %c0_i32 = arith.constant 0 : i32
    %c0_i32_0 = arith.constant 0 : i32
    %c0_i32_1 = arith.constant 0 : i32
    return %c0_i32, %c0_i32_0 : i32, i32
  }
  func.func @transform_7(%arg0: i32) -> (i32, i32) {
    %c0_i32 = arith.constant 0 : i32
    %c0_i32_0 = arith.constant 0 : i32
    %c0_i32_1 = arith.constant 0 : i32
    return %c0_i32, %c0_i32_0 : i32, i32
  }
  func.func @transform_8(%arg0: i32) -> (i32, i32) {
    %c0_i32 = arith.constant 0 : i32
    %c0_i32_0 = arith.constant 0 : i32
    %c0_i32_1 = arith.constant 0 : i32
    return %c0_i32, %c0_i32_0 : i32, i32
  }
  func.func @transform_9(%arg0: i32) -> (i32, i32) {
    %c0_i32 = arith.constant 0 : i32
    %c0_i32_0 = arith.constant 0 : i32
    %c0_i32_1 = arith.constant 0 : i32
    return %c0_i32, %c0_i32_0 : i32, i32
  }
  func.func @transform_10(%arg0: i32) -> (i32, i32) {
    %c0_i32 = arith.constant 0 : i32
    %c0_i32_0 = arith.constant 0 : i32
    %c0_i32_1 = arith.constant 0 : i32
    return %c0_i32, %c0_i32_0 : i32, i32
  }
  func.func @transform_11(%arg0: i32) -> (i32, i32) {
    %c0_i32 = arith.constant 0 : i32
    %c0_i32_0 = arith.constant 0 : i32
    return %arg0, %c0_i32 : i32, i32
  }
  func.func @transform_12(%arg0: i32) -> (i32, i32) {
    %c0_i32 = arith.constant 0 : i32
    %c0_i32_0 = arith.constant 0 : i32
    %c0_i32_1 = arith.constant 0 : i32
    return %c0_i32, %c0_i32_0 : i32, i32
  }
}

</mosaic_0001>

<bundles_post_ra>
// kernel: tpu_custom_call.1
= control target key start
LH: loop header
LB: loop body
LE: loop exit
PB: predicated region body
PF: predicated region fallthrough
CT: control target
= control target key end

     0   :  { %18 = vsyncpa [#allocation3], 0  ;;  %s3312_s0 = inlined_call_operand.hbm [shape: f32[256,128], index: 0, kind: input, shape index: {}]   ;;  %s3313_s1 = inlined_call_operand.vmem [shape: f32[1,128], index: 1, kind: input, shape index: {}]   ;;  %s3314_s2 = inlined_call_operand.vmem [shape: f32[128,128], index: 2, kind: input, shape index: {}]   ;;  %s3315_s3 = inlined_call_operand.vmem [shape: f32[128,64], index: 3, kind: input, shape index: {}]   ;;  %s3316_s4 = inlined_call_operand.vmem [shape: f32[1,64], index: 4, kind: input, shape index: {}]   ;;  %s3317_s5 = inlined_call_operand.vmem [shape: f32[64,32], index: 5, kind: input, shape index: {}]   ;;  %s3318_s6 = inlined_call_operand.vmem [shape: f32[1,32], index: 6, kind: input, shape index: {}]   ;;  %s3319_s7 = inlined_call_operand.vmem [shape: f32[32,64], index: 7, kind: input, shape index: {}]   ;;  %s3320_s8 = inlined_call_operand.vmem [shape: f32[1,64], index: 8, kind: input, shape index: {}]   ;;  %s3321_s9 = inlined_call_operand.vmem [shape: f32[64,128], index: 9, kind: input, shape index: {}]   ;;  %s3322_s10 = inlined_call_operand.vmem [shape: f32[1,128], index: 10, kind: input, shape index: {}]   ;;  %s3323_s11 = inlined_call_operand.hbm [shape: f32[256,128], index: 11, kind: output, shape index: {0}]   ;;  %s3324_s12 = inlined_call_operand.hbm [shape: f32[128,128], index: 12, kind: output, shape index: {1}]  }
   0x1   :  { %20 = vsyncpa [#allocation3 + $0x1], 0 }
   0x2   :  { %21 = vsyncpa [#allocation4], 0 }
   0x3   :  { %23 = vsyncpa [#allocation4 + $0x1], 0 }
   0x4   :  { %24 = vsyncpa [#allocation7], 0  ;;  %s2546_s21 = smov 0   ;;  %s2548_s22 = smov 0  }
   0x5   :  { %s2550_s23 = smov 0   ;;  %s2552_s24 = smov 0  }
   0x6 LB: > { %3333 = sst [smem:[#allocation11_spill]] %s2460_s21  ;;  %s2567_s25 = sadd.s32 4294967295, %s2472_s24   ;;  %s2472_s24 = sphi %s2552_s24, %s3353_s24   ;;  %s2468_s23 = sphi %s2550_s23, %s3355_s23   ;;  %s2464_s22 = sphi %s2548_s22, %s3357_s22   ;;  %s2460_s21 = sphi %s2546_s21, %s3356_s21  }
   0x7   : > { %3334 = sst [smem:[#allocation12_spill]] %s2468_s23  ;;  %s2010_s26 = sadd.s32 4294967294, %s2472_s24  }
   0x8   : > { %s2571_s27 = sadd.s32 1, %s2472_s24   ;;  %s37_s28 = sadd.s32 1, %s2468_s23 }
   0x9   : > { %3335 = sst [smem:[#allocation13_spill]] %s2571_s27  ;;  %s34_s29 = ssub.s32 %s2472_s24, %s2571_s27 }
   0xa   : > { %p44_p0 = scmp.ne.s32.totalorder %s2468_s23, %s2464_s22  ;;  %p35_p1 = scmp.eq.s32.totalorder %s34_s29, 0 }
   0xb   : > { %p45_p2 = scmp.eq.s32.totalorder %s2472_s24, 0  ;;  %p50_p3 = scmp.ne.s32.totalorder %s2464_s22, %s2460_s21 }
   0xc   : > { %p51_p4 = scmp.eq.s32.totalorder %s2567_s25, 0  ;;  %p3332_p7 = scmp.eq.s32.totalorder %s2567_s25, 1 }
   0xd   : > { %s2583_s30 = scalar_select %p35_p1, %s2468_s23, %s37_s28  }
   0xe   : > { %p2585_p5 = por %p45_p2, %p44_p0  ;;  %p2589_p6 = por %p51_p4, %p50_p3 }
   0xf   : > { %3336 = sst [smem:[#allocation14_spill]] %s2583_s30  ;;  %p290_p8 = scmp.eq.s32.totalorder %s2010_s26, 1 }
  0x10   : > { %p2169_p10 = scmp.lt.s32.totalorder %s2472_s24, 2  ;;  %p2598_p11 = por %p3332_p7, %p44_p0 }
  0x11   : > { %p2602_p12 = por %p290_p8, %p50_p3  ;;  %s361_s17 = sand.u32 1, %s2468_s23  }
  0x12   : > { %s3339_s15 = scalar_select %p2598_p11, 1, 0 }
  0x13   : > { %s3341_s16 = scalar_select %p2602_p12, 1, 0 }
  0x14   : > { %3340 = sst [smem:[#allocation15_spill]] %s3339_s15  ;;  %s2091_s18 = sshll.u32 %s2472_s24, 7 }
  0x15   : > { %3342 = sst [smem:[#allocation16_spill]] %s3341_s16  ;;  %s2013_s19 = sshll.u32 %s361_s17, 7 }
  0x16   : > { %s370_s29 = scalar_lea.hbm %s3312_s0, %s2091_s18  ;;  %s365_s30 = scalar_lea.vmem [#allocation2], %s2013_s19 }
  0x17   : > { %s371_s26 = sshll.u32 %s370_s29, 4  ;;  %s373_s27 = sshll.u32 %s365_s30, 4  ;;  %s372_s26 = int_to_ptr.hbm [resolvable:$true] %s371_s26  ;;  %s374_s27 = int_to_ptr.vmem [resolvable:$true] %s373_s27 }
  0x18   : > { %p2613_p13 = pnand %p2169_p10, %p2585_p5  ;;  %p2016_p0 = scmp.ge.s32.totalorder %s2472_s24, 1 }
  0x19   : > { %p381_p1 = scmp.lt.s32.totalorder %s2472_s24, 3  ;;  %s362_s23 = scalar_lea.sflag [#allocation3], %s361_s17 }
  0x1a   : > { %s2344_s16 = sshra.s32 %s372_s26, 4  ;;  %p2348_p3 = pneg %p2613_p13  ;;  %s2345_s16 = int_to_ptr.hbm [resolvable:$true] %s2344_s16 }
  0x1b   : > { %s2346_s15 = scalar_lea.hbm %s2345_s16, 128  ;;  %s2351_s13 = scalar_lea.hbm %s3312_s0, 256 }
  0x1c   : > { %p2347_p2 = scmp.ne.s32.totalorder %s2345_s16, %s2346_s15  ;;  %p2352_p5 = scmp.lt.s32.totalorder %s2345_s16, %s3312_s0 }
  0x1d   : > { %p2353_p10 = scmp.lt.s32.totalorder %s2351_s13, %s2346_s15 }
  0x1e   : > { %p2349_p4 = pnand %p2348_p3, %p2347_p2 }
  0x1f   : > { %p2354_p9 = por %p2353_p10, %p2352_p5 }
  0x20   : > { %p2350_p8 = pneg %p2349_p4 }
  0x22   : > { %p2355_p7 = pnand %p2354_p9, %p2350_p8 }
  0x24   : > { %2358 = shalt.err (!%p2355_p7)
}
  0x25   : > { %s2474_s17 = smov 128   ;;  %s2475_s28 = smov 8  }
  0x26   : > { %2164 = dma.hbm_to_vmem [thread:$0]  (!%p2613_p13), %s372_s26, 2048, %s374_s27, %s362_s23, %s2474_s17, %s2474_s17, %s2475_s28  }
  0x27   : > { %p382_p2 = pnand %p2016_p0, %p381_p1 }
  0x28   : > { %s2634_s29 = sand.u32 (!%p382_p2), 1, %s2464_s22  }
  0x29   : > { %385 = sbr.rel (%p382_p2) target bundleno = 1288 (0x508), region = 64  ;;  %s2017_s15 = sshll.u32 (!%p382_p2), %s2634_s29, 7 }
  0x2a   : > { %s388_s16 = scalar_lea.sflag (!%p382_p2), [#allocation3], %s2634_s29  ;;  %s2640_s30 = scalar_lea.vmem (!%p382_p2), [#allocation2], %s2017_s15 }
  0x2e   : > { %2447 = dma.done.wait (%p2589_p6), %s388_s16, 2048  }
  0x2f   : > { %2449 = vsyncadd (%p2589_p6), %s388_s16, 4294965248  ;;  %v466_v0 = vld [vmem:[%s3314_s2 + $0x78] sm:$0xff]  ;;  %v465_v1 = vld [vmem:[%s3314_s2 + $0x70] sm:$0xff]  ;;  %p2019_p6 = scmp.ne.s32.totalorder %s2567_s25, 0 }
  0x30   : > { %467 = vmatpush.msra.mxu0 %v466_v0  ;;  %2093 = vmatpush.msra.mxu1 %v466_v0  ;;  %v464_v2 = vld [vmem:[%s3314_s2 + $0x68] sm:$0xff]  ;;  %v463_v3 = vld [vmem:[%s3314_s2 + $0x60] sm:$0xff]  ;;  %v462_v4 = vld [vmem:[%s3314_s2 + $0x58] sm:$0xff] }
  0x31   : > { %v461_v5 = vld [vmem:[%s3314_s2 + $0x50] sm:$0xff]  ;;  %v460_v6 = vld [vmem:[%s3314_s2 + $0x48] sm:$0xff]  ;;  %v459_v7 = vld [vmem:[%s3314_s2 + $0x40] sm:$0xff] }
  0x32   : > { %468 = vmatpush.msra.mxu0 %v465_v1  ;;  %2094 = vmatpush.msra.mxu1 %v465_v1  ;;  %v458_v8 = vld [vmem:[%s3314_s2 + $0x38] sm:$0xff]  ;;  %v457_v9 = vld [vmem:[%s3314_s2 + $0x30] sm:$0xff]  ;;  %v456_v10 = vld [vmem:[%s3314_s2 + $0x28] sm:$0xff] }
  0x33   : > { %v455_v11 = vld [vmem:[%s3314_s2 + $0x20] sm:$0xff]  ;;  %v454_v12 = vld [vmem:[%s3314_s2 + $0x18] sm:$0xff]  ;;  %v453_v13 = vld [vmem:[%s3314_s2 + $0x10] sm:$0xff] }
  0x34   : > { %469 = vmatpush.msra.mxu0 %v464_v2  ;;  %2095 = vmatpush.msra.mxu1 %v464_v2  ;;  %v452_v14 = vld [vmem:[%s3314_s2 + $0x8] sm:$0xff]  ;;  %v451_v15 = vld [vmem:[%s3314_s2] sm:$0xff]  ;;  %v2711_v20 = vld [vmem:[%s2640_s30 + $0x10] sm:$0xff] }
  0x35   : > { %v2695_v16 = vld [vmem:[%s2640_s30] sm:$0xff]  ;;  %v2703_v18 = vld [vmem:[%s2640_s30 + $0x8] sm:$0xff]  ;;  %v2714_v21 = vld [vmem:[%s2640_s30 + $0x50] sm:$0xff] }
  0x36   : > { %470 = vmatpush.msra.mxu0 %v463_v3  ;;  %2096 = vmatpush.msra.mxu1 %v463_v3  ;;  %v2698_v17 = vld [vmem:[%s2640_s30 + $0x40] sm:$0xff]  ;;  %v2706_v19 = vld [vmem:[%s2640_s30 + $0x48] sm:$0xff]  ;;  %v2719_v22 = vld [vmem:[%s2640_s30 + $0x18] sm:$0xff] }
  0x37   : > { %v2722_v23 = vld [vmem:[%s2640_s30 + $0x58] sm:$0xff]  ;;  %v2727_v24 = vld [vmem:[%s2640_s30 + $0x20] sm:$0xff]  ;;  %v2735_v26 = vld [vmem:[%s2640_s30 + $0x28] sm:$0xff] }
  0x38   : > { %471 = vmatpush.msra.mxu0 %v462_v4  ;;  %2097 = vmatpush.msra.mxu1 %v462_v4  ;;  %v2730_v25 = vld [vmem:[%s2640_s30 + $0x60] sm:$0xff]  ;;  %v2738_v27 = vld [vmem:[%s2640_s30 + $0x68] sm:$0xff]  ;;  %v2743_v28 = vld [vmem:[%s2640_s30 + $0x30] sm:$0xff] }
  0x39   : > { %v2746_v29 = vld [vmem:[%s2640_s30 + $0x70] sm:$0xff]  ;;  %v2751_v30 = vld [vmem:[%s2640_s30 + $0x38] sm:$0xff] }
  0x3a   : > { %472 = vmatpush.msra.mxu0 %v461_v5  ;;  %2098 = vmatpush.msra.mxu1 %v461_v5  ;;  %v2754_v31 = vld [vmem:[%s2640_s30 + $0x78] sm:$0xff]  ;;  %s2950_s30 = scalar_lea.vmem [#allocation5], %s2017_s15 }
  0x3c   : > { %473 = vmatpush.msra.mxu0 %v460_v6  ;;  %2099 = vmatpush.msra.mxu1 %v460_v6 }
  0x3e   : > { %474 = vmatpush.msra.mxu0 %v459_v7  ;;  %2100 = vmatpush.msra.mxu1 %v459_v7 }
  0x40   : > { %475 = vmatpush.msra.mxu0 %v458_v8  ;;  %2101 = vmatpush.msra.mxu1 %v458_v8 }
  0x42   : > { %476 = vmatpush.msra.mxu0 %v457_v9  ;;  %2102 = vmatpush.msra.mxu1 %v457_v9 }
  0x44   : > { %477 = vmatpush.msra.mxu0 %v456_v10  ;;  %2103 = vmatpush.msra.mxu1 %v456_v10 }
  0x46   : > { %478 = vmatpush.msra.mxu0 %v455_v11  ;;  %2104 = vmatpush.msra.mxu1 %v455_v11 }
  0x48   : > { %479 = vmatpush.msra.mxu0 %v454_v12  ;;  %2105 = vmatpush.msra.mxu1 %v454_v12 }
  0x4a   : > { %480 = vmatpush.msra.mxu0 %v453_v13  ;;  %2106 = vmatpush.msra.mxu1 %v453_v13 }
  0x4c   : > { %481 = vmatpush.msra.mxu0 %v452_v14  ;;  %2107 = vmatpush.msra.mxu1 %v452_v14 }
  0x4e   : > { %482 = vmatpush.msra.mxu0 %v451_v15  ;;  %2108 = vmatpush.msra.mxu1 %v451_v15 }
  0x4f   : > { %483 = vmatmul.f32.vlgmr.msra.gmra.mxu0 %v2695_v16  ;;  %507 = vmatmul.f32.vlgmr.msra.gmra.mxu1 %v2698_v17 }
  0x57   : > { %486 = vmatmul.f32.gmra.mxu0 %v2703_v18  ;;  %510 = vmatmul.f32.gmra.mxu1 %v2706_v19 }
  0x5f   : > { %489 = vmatmul.f32.gmra.mxu0 %v2711_v20  ;;  %513 = vmatmul.f32.gmra.mxu1 %v2714_v21 }
  0x67   : > { %492 = vmatmul.f32.gmra.mxu0 %v2719_v22  ;;  %516 = vmatmul.f32.gmra.mxu1 %v2722_v23 }
  0x6f   : > { %495 = vmatmul.f32.gmra.mxu0 %v2727_v24  ;;  %519 = vmatmul.f32.gmra.mxu1 %v2730_v25 }
  0x77   : > { %498 = vmatmul.f32.gmra.mxu0 %v2735_v26  ;;  %522 = vmatmul.f32.gmra.mxu1 %v2738_v27 }
  0x7f   : > { %501 = vmatmul.f32.gmra.mxu0 %v2743_v28  ;;  %525 = vmatmul.f32.gmra.mxu1 %v2746_v29 }
  0x87   : > { %504 = vmatmul.f32.gmra.mxu0 %v2751_v30  ;;  %528 = vmatmul.f32.gmra.mxu1 %v2754_v31 }
  0xcc   : > { %v484_v32 = vpop.f32.mrf.mxu0  ;;  %v508_v33 = vpop.f32.mrf.mxu1 }
  0xcd   : > { %548 = vmax.xlane.f32.xlu2 %v508_v33  ;;  %532 = vmax.xlane.f32.xlu0 %v484_v32 }
  0xd4   : > { %v487_v34 = vpop.f32.mrf.mxu0  ;;  %v511_v35 = vpop.f32.mrf.mxu1 }
  0xd5   : > { %534 = vmax.xlane.f32.xlu0 %v487_v34 }
  0xdc   : > { %v490_v36 = vpop.f32.mrf.mxu0  ;;  %v514_v37 = vpop.f32.mrf.mxu1 }
  0xdd   : > { %550 = vmax.xlane.f32.xlu0 %v511_v35  ;;  %536 = vmax.xlane.f32.xlu1 %v490_v36 }
  0xe4   : > { %v2758_v38 = vpop.f32.mrf.mxu0  ;;  %v517_v39 = vpop.f32.mrf.mxu1 }
  0xe5   : > { %554 = vmax.xlane.f32.xlu2 %v517_v39  ;;  %552 = vmax.xlane.f32.xlu1 %v514_v37 }
  0xec   : > { %v2760_v40 = vpop.f32.mrf.mxu0  ;;  %v2762_v41 = vpop.f32.mrf.mxu1 }
  0xed   : > { %556 = vmax.xlane.f32.xlu0 %v2762_v41  ;;  %538 = vmax.xlane.f32.xlu1 %v2758_v38 }
  0xee   : > { %540 = vmax.xlane.f32.xlu2 %v2760_v40 }
  0xf4   : > { %v2767_v42 = vpop.f32.mrf.mxu0  ;;  %v2769_v43 = vpop.f32.mrf.mxu1 }
  0xf6   : > { %542 = vmax.xlane.f32.xlu2 %v2767_v42 }
  0xfc   : > { %v2772_v44 = vpop.f32.mrf.mxu0  ;;  %v2774_v45 = vpop.f32.mrf.mxu1 }
  0xfd   : > { %544 = vmax.xlane.f32.xlu0 %v2772_v44 }
  0xfe   : > { %560 = vmax.xlane.f32.xlu2 %v2774_v45 }
 0x104   : > { %v2778_v46 = vpop.f32.mrf.mxu0  ;;  %v2780_v47 = vpop.f32.mrf.mxu1 }
 0x105   : > { %562 = vmax.xlane.f32.xlu0 %v2780_v47  ;;  %546 = vmax.xlane.f32.xlu1 %v2778_v46 }
 0x10d   : > { %558 = vmax.xlane.f32.xlu1 %v2769_v43 }
 0x140   : > { %v549_v48 = vpop.xlane.xlu2 %548  ;;  %v533_v49 = vpop.xlane.xlu0 %532 }
 0x141   : > { %v572_v50 = vsub.f32 %v508_v33, %v549_v48  ;;  %v564_v51 = vsub.f32 %v484_v32, %v533_v49 }
 0x143   : > { %v596_v52 = vmul.f32 1.442695, %v572_v50  ;;  %v580_v53 = vmul.f32 1.442695, %v564_v51 }
 0x145   : > { %2211 = vpow2.f32 %v596_v52 }
 0x146   : > { %2213 = vpow2.f32 %v580_v53 }
 0x148   : > { %v535_v54 = vpop.xlane.xlu0 %534 }
 0x149   : > { %v565_v55 = vsub.f32 %v487_v34, %v535_v54 }
 0x14b   : > { %v2785_v56 = vpop.eup %2211  ;;  %v582_v57 = vmul.f32 1.442695, %v565_v55 }
 0x14c   : > { %v2787_v58 = vpop.eup %2213  ;;  %628 = vadd.xlane.f32.xlu0 %v2785_v56 }
 0x14d   : > { %2215 = vpow2.f32 %v582_v57  ;;  %612 = vadd.xlane.f32.xlu1 %v2787_v58 }
 0x150   : > { %v551_v59 = vpop.xlane.xlu0 %550  ;;  %v537_v60 = vpop.xlane.xlu1 %536 }
 0x151   : > { %v573_v61 = vsub.f32 %v511_v35, %v551_v59  ;;  %v566_v62 = vsub.f32 %v490_v36, %v537_v60 }
 0x153   : > { %v2791_v63 = vpop.eup %2215  ;;  %v598_v0 = vmul.f32 1.442695, %v573_v61  ;;  %v584_v1 = vmul.f32 1.442695, %v566_v62 }
 0x154   : > { %614 = vadd.xlane.f32.xlu2 %v2791_v63 }
 0x155   : > { %2217 = vpow2.f32 %v598_v0 }
 0x156   : > { %2219 = vpow2.f32 %v584_v1 }
 0x158   : > { %v555_v2 = vpop.xlane.xlu2 %554  ;;  %v553_v3 = vpop.xlane.xlu1 %552 }
 0x159   : > { %v575_v4 = vsub.f32 %v517_v39, %v555_v2  ;;  %v574_v5 = vsub.f32 %v514_v37, %v553_v3 }
 0x15b   : > { %v2794_v6 = vpop.eup %2217  ;;  %v602_v7 = vmul.f32 1.442695, %v575_v4  ;;  %v600_v8 = vmul.f32 1.442695, %v574_v5 }
 0x15c   : > { %v2796_v9 = vpop.eup %2219  ;;  %630 = vadd.xlane.f32.xlu1 %v2794_v6 }
 0x15d   : > { %2221 = vpow2.f32 %v602_v7  ;;  %616 = vadd.xlane.f32.xlu0 %v2796_v9 }
 0x15e   : > { %2223 = vpow2.f32 %v600_v8 }
 0x160   : > { %v539_v10 = vpop.xlane.xlu1 %538  ;;  %v557_v13 = vpop.xlane.xlu0 %556 }
 0x161   : > { %v567_v11 = vsub.f32 %v2758_v38, %v539_v10  ;;  %v541_v12 = vpop.xlane.xlu2 %540  ;;  %v576_v35 = vsub.f32 %v2762_v41, %v557_v13 }
 0x162   : > { %v568_v14 = vsub.f32 %v2760_v40, %v541_v12 }
 0x163   : > { %v2802_v15 = vpop.eup %2221  ;;  %v586_v32 = vmul.f32 1.442695, %v567_v11  ;;  %v604_v36 = vmul.f32 1.442695, %v576_v35 }
 0x164   : > { %v2804_v33 = vpop.eup %2223  ;;  %v588_v34 = vmul.f32 1.442695, %v568_v14 }
 0x165   : > { %632 = vadd.xlane.f32.xlu2 %v2804_v33  ;;  %634 = vadd.xlane.f32.xlu0 %v2802_v15  ;;  %2225 = vpow2.f32 %v586_v32 }
 0x166   : > { %2227 = vpow2.f32 %v588_v34 }
 0x167   : > { %2229 = vpow2.f32 %v604_v36 }
 0x169   : > { %v543_v37 = vpop.xlane.xlu2 %542 }
 0x16a   : > { %v569_v38 = vsub.f32 %v2767_v42, %v543_v37 }
 0x16b   : > { %v2810_v39 = vpop.eup %2225 }
 0x16c   : > { %v590_v40 = vmul.f32 1.442695, %v569_v38  ;;  %v2812_v48 = vpop.eup %2227  ;;  %618 = vadd.xlane.f32.xlu1 %v2810_v39 }
 0x16d   : > { %620 = vadd.xlane.f32.xlu2 %v2812_v48  ;;  %v2818_v52 = vpop.eup %2229 }
 0x16e   : > { %2231 = vpow2.f32 %v590_v40 }
 0x170   : > { %v545_v41 = vpop.xlane.xlu0 %544 }
 0x171   : > { %v561_v49 = vpop.xlane.xlu2 %560  ;;  %v570_v50 = vsub.f32 %v2772_v44, %v545_v41 }
 0x172   : > { %v578_v51 = vsub.f32 %v2774_v45, %v561_v49 }
 0x173   : > { %v592_v42 = vmul.f32 1.442695, %v570_v50 }
 0x174   : > { %v2820_v53 = vpop.eup %2231  ;;  %v608_v54 = vmul.f32 1.442695, %v578_v51  ;;  %636 = vadd.xlane.f32.xlu1 %v2818_v52 }
 0x175   : > { %2233 = vpow2.f32 %v592_v42  ;;  %622 = vadd.xlane.f32.xlu0 %v2820_v53 }
 0x176   : > { %2235 = vpow2.f32 %v608_v54 }
 0x178   : > { %v563_v55 = vpop.xlane.xlu0 %562  ;;  %v547_v57 = vpop.xlane.xlu1 %546 }
 0x179   : > { %v579_v59 = vsub.f32 %v2780_v47, %v563_v55  ;;  %v571_v44 = vsub.f32 %v2778_v46, %v547_v57 }
 0x17b   : > { %v2826_v60 = vpop.eup %2233  ;;  %v610_v45 = vmul.f32 1.442695, %v579_v59  ;;  %v594_v61 = vmul.f32 1.442695, %v571_v44 }
 0x17c   : > { %v2828_v62 = vpop.eup %2235  ;;  %624 = vadd.xlane.f32.xlu1 %v2826_v60 }
 0x17d   : > { %2237 = vpow2.f32 %v610_v45  ;;  %640 = vadd.xlane.f32.xlu0 %v2828_v62 }
 0x17e   : > { %2239 = vpow2.f32 %v594_v61 }
 0x180   : > { %v559_v0 = vpop.xlane.xlu1 %558 }
 0x181   : > { %v577_v1 = vsub.f32 %v2769_v43, %v559_v0 }
 0x183   : > { %v2833_v2 = vpop.eup %2237  ;;  %v606_v47 = vmul.f32 1.442695, %v577_v1 }
 0x184   : > { %v2835_v3 = vpop.eup %2239  ;;  %642 = vadd.xlane.f32.xlu1 %v2833_v2 }
 0x185   : > { %2241 = vpow2.f32 %v606_v47  ;;  %626 = vadd.xlane.f32.xlu2 %v2835_v3 }
 0x18b   : > { %v2839_v46 = vpop.eup %2241 }
 0x18d   : > { %638 = vadd.xlane.f32.xlu2 %v2839_v46 }
 0x1bf   : > { %v629_v4 = vpop.xlane.xlu0 %628 }
 0x1c0   : > { %2243 = vrcp.f32 %v629_v4  ;;  %v613_v5 = vpop.xlane.xlu1 %612  ;;  %v767_v13 = vand.u32 2147483648, %v629_v4  ;;  %v765_v34 = vand.u32 2147483647, %v629_v4  ;;  %vm761_vm2 = vweird.f32 %v629_v4 }
 0x1c1   : > { %2245 = vrcp.f32 %v613_v5  ;;  %v655_v35 = vand.u32 2147483648, %v613_v5  ;;  %v653_v37 = vand.u32 2147483647, %v613_v5  ;;  %vm649_vm4 = vweird.f32 %v613_v5 }
 0x1c2   : > { %v768_v41 = vor.u32 1.1754944e-38, %v767_v13  ;;  %vm766_vm5 = vcmp.eq.f32.partialorder %v765_v34, 8.507059e+37 }
 0x1c3   : > { %v656_v51 = vor.u32 1.1754944e-38, %v655_v35  ;;  %vm654_vm7 = vcmp.eq.f32.partialorder %v653_v37, 8.507059e+37 }
 0x1c6   : > { %v2244_v7 = vpop.eup %2243 }
 0x1c7   : > { %v2246_v43 = vpop.eup %2245  ;;  %v757_v8 = vmul.f32 %v2244_v7, %v629_v4  ;;  %v615_v10 = vpop.xlane.xlu2 %614  ;;  %vm762_vm0 = vweird.f32 %v2244_v7 }
 0x1c8   : > { %v645_v11 = vmul.f32 %v2246_v43, %v613_v5  ;;  %2247 = vrcp.f32 %v615_v10  ;;  %vm650_vm1 = vweird.f32 %v2246_v43  ;;  %vm763_vm3 = vmor %vm761_vm2, %vm762_vm0  ;;  %v669_v1 = vand.u32 2147483648, %v615_v10 }
 0x1c9   : > { %v758_v12 = vsub.f32 1.0, %v757_v8  ;;  %vm651_vm6 = vmor %vm649_vm4, %vm650_vm1  ;;  %v667_v4 = vand.u32 2147483647, %v615_v10  ;;  %vm663_vm9 = vweird.f32 %v615_v10 }
 0x1ca   : > { %v646_v14 = vsub.f32 1.0, %v645_v11 }
 0x1cb   : > { %v759_v32 = vmul.f32 %v2244_v7, %v758_v12  ;;  %vm668_vm11 = vcmp.eq.f32.partialorder %v667_v4, 8.507059e+37 }
 0x1cc   : > { %v647_v36 = vmul.f32 %v2246_v43, %v646_v14 }
 0x1cd   : > { %v760_v38 = vadd.f32 %v2244_v7, %v759_v32 }
 0x1ce   : > { %v2248_v40 = vpop.eup %2247  ;;  %v648_v49 = vadd.f32 %v2246_v43, %v647_v36 }
 0x1cf   : > { %v764_v50 = vsel %vm763_vm3, %v2244_v7, %v760_v38  ;;  %v659_v42 = vmul.f32 %v2248_v40, %v615_v10  ;;  %v631_v54 = vpop.xlane.xlu1 %630  ;;  %vm664_vm8 = vweird.f32 %v2248_v40 }
 0x1d0   : > { %v769_v55 = vsel %vm766_vm5, %v768_v41, %v764_v50  ;;  %v652_v57 = vsel %vm651_vm6, %v2246_v43, %v648_v49  ;;  %v617_v59 = vpop.xlane.xlu0 %616  ;;  %2249 = vrcp.f32 %v631_v54  ;;  %vm665_vm10 = vmor %vm663_vm9, %vm664_vm8  ;;  %v670_v43 = vor.u32 1.1754944e-38, %v669_v1 }
 0x1d1   : > { %v2843_v44 = vmul.f32 %v2785_v56, %v769_v55  ;;  %v657_v45 = vsel %vm654_vm7, %v656_v51, %v652_v57  ;;  %v660_v61 = vsub.f32 1.0, %v659_v42  ;;  %2251 = vrcp.f32 %v617_v59 }
 0x1d2   : > { %v2846_v0 = vmul.f32 %v2787_v58, %v657_v45  ;;  %v781_v36 = vand.u32 2147483648, %v631_v54  ;;  %v683_v10 = vand.u32 2147483648, %v617_v59  ;;  %v779_v38 = vand.u32 2147483647, %v631_v54 }
 0x1d3   : > { %v661_v47 = vmul.f32 %v2248_v40, %v660_v61  ;;  %v681_v41 = vand.u32 2147483647, %v617_v59  ;;  %vm775_vm14 = vweird.f32 %v631_v54  ;;  %vm677_vm15 = vweird.f32 %v617_v59 }
 0x1d4   : > { %v684_v42 = vor.u32 1.1754944e-38, %v683_v10  ;;  %vm780_vm2 = vcmp.eq.f32.partialorder %v779_v38, 8.507059e+37 }
 0x1d5   : > { %v662_v5 = vadd.f32 %v2248_v40, %v661_v47  ;;  %vm682_vm3 = vcmp.eq.f32.partialorder %v681_v41, 8.507059e+37 }
 0x1d6   : > { %v2250_v7 = vpop.eup %2249 }
 0x1d7   : > { %v2252_v8 = vpop.eup %2251  ;;  %v666_v11 = vsel %vm665_vm10, %v2248_v40, %v662_v5  ;;  %v771_v56 = vmul.f32 %v2250_v7, %v631_v54  ;;  %vm776_vm12 = vweird.f32 %v2250_v7 }
 0x1d8   : > { %v671_v12 = vsel %vm668_vm11, %v670_v43, %v666_v11  ;;  %v673_v13 = vmul.f32 %v2252_v8, %v617_v59  ;;  %v633_v14 = vpop.xlane.xlu2 %632  ;;  %v2848_v32 = vpop.xlane.xlu0 %634  ;;  %vm678_vm13 = vweird.f32 %v2252_v8  ;;  %vm777_vm0 = vmor %vm775_vm14, %vm776_vm12 }
 0x1d9   : > { %v2851_v58 = vmul.f32 %v2791_v63, %v671_v12  ;;  %v772_v34 = vsub.f32 1.0, %v771_v56  ;;  %2253 = vrcp.f32 %v633_v14  ;;  %v782_v63 = vor.u32 1.1754944e-38, %v781_v36  ;;  %vm679_vm1 = vmor %vm677_vm15, %vm678_vm13 }
 0x1da   : > { %v674_v35 = vsub.f32 1.0, %v673_v13  ;;  %2255 = vrcp.f32 %v2848_v32  ;;  %v793_v12 = vand.u32 2147483647, %v633_v14  ;;  %v809_v13 = vand.u32 2147483648, %v2848_v32 }
 0x1db   : > { %v773_v37 = vmul.f32 %v2250_v7, %v772_v34  ;;  %vm789_vm6 = vweird.f32 %v633_v14  ;;  %vm803_vm8 = vweird.f32 %v2848_v32 }
 0x1dc   : > { %v675_v40 = vmul.f32 %v2252_v8, %v674_v35  ;;  %vm794_vm9 = vcmp.eq.f32.partialorder %v793_v12, 8.507059e+37  ;;  %v810_v38 = vor.u32 1.1754944e-38, %v809_v13 }
 0x1dd   : > { %v774_v49 = vadd.f32 %v2250_v7, %v773_v37 }
 0x1de   : > { %v676_v50 = vadd.f32 %v2252_v8, %v675_v40 }
 0x1df   : > { %v2254_v51 = vpop.eup %2253  ;;  %v778_v55 = vsel %vm777_vm0, %v2250_v7, %v774_v49  ;;  %v2854_v47 = vpop.xlane.xlu1 %618  ;;  %v795_v7 = vand.u32 2147483648, %v633_v14 }
 0x1e0   : > { %v2256_v57 = vpop.eup %2255  ;;  %v680_v45 = vsel %vm679_vm1, %v2252_v8, %v676_v50  ;;  %v783_v61 = vsel %vm780_vm2, %v782_v63, %v778_v55  ;;  %v785_v1 = vmul.f32 %v2254_v51, %v633_v14  ;;  %v621_v59 = vpop.xlane.xlu2 %620  ;;  %vm790_vm4 = vweird.f32 %v2254_v51 }
 0x1e1   : > { %v685_v4 = vsel %vm682_vm3, %v684_v42, %v680_v45  ;;  %v2857_v5 = vmul.f32 %v2794_v6, %v783_v61  ;;  %v799_v54 = vmul.f32 %v2256_v57, %v2848_v32  ;;  %2257 = vrcp.f32 %v621_v59  ;;  %vm791_vm7 = vmor %vm789_vm6, %vm790_vm4 }
 0x1e2   : > { %v2861_v43 = vmul.f32 %v2796_v9, %v685_v4  ;;  %v786_v11 = vsub.f32 1.0, %v785_v1  ;;  %2259 = vrcp.f32 %v2854_v47  ;;  %vm804_vm5 = vweird.f32 %v2256_v57 }
 0x1e3   : > { %v800_v56 = vsub.f32 1.0, %v799_v54  ;;  %v807_v6 = vand.u32 2147483647, %v2848_v32  ;;  %v796_v9 = vor.u32 1.1754944e-38, %v795_v7  ;;  %vm805_vm10 = vmor %vm803_vm8, %vm804_vm5  ;;  %v711_v61 = vand.u32 2147483648, %v621_v59 }
 0x1e4   : > { %v787_v8 = vmul.f32 %v2254_v51, %v786_v11  ;;  %v697_v54 = vand.u32 2147483648, %v2854_v47  ;;  %v695_v11 = vand.u32 2147483647, %v2854_v47  ;;  %vm705_vm14 = vweird.f32 %v621_v59 }
 0x1e5   : > { %v801_v34 = vmul.f32 %v2256_v57, %v800_v56  ;;  %vm808_vm11 = vcmp.eq.f32.partialorder %v807_v6, 8.507059e+37  ;;  %vm691_vm0 = vweird.f32 %v2854_v47 }
 0x1e6   : > { %v788_v35 = vadd.f32 %v2254_v51, %v787_v8  ;;  %v698_v6 = vor.u32 1.1754944e-38, %v697_v54  ;;  %vm696_vm3 = vcmp.eq.f32.partialorder %v695_v11, 8.507059e+37 }
 0x1e7   : > { %v802_v36 = vadd.f32 %v2256_v57, %v801_v34  ;;  %v2258_v10 = vpop.eup %2257  ;;  %v2869_v41 = vpop.xlane.xlu1 %636 }
 0x1e8   : > { %v792_v37 = vsel %vm791_vm7, %v2254_v51, %v788_v35  ;;  %v2867_v40 = vpop.xlane.xlu0 %622  ;;  %v2260_v49 = vpop.eup %2259  ;;  %v701_v42 = vmul.f32 %v2258_v10, %v621_v59  ;;  %vm706_vm12 = vweird.f32 %v2258_v10  ;;  %vm817_vm6 = vweird.f32 %v2869_v41 }
 0x1e9   : > { %v797_v50 = vsel %vm794_vm9, %v796_v9, %v792_v37  ;;  %v806_v63 = vsel %vm805_vm10, %v2256_v57, %v802_v36  ;;  %v687_v32 = vmul.f32 %v2260_v49, %v2854_v47  ;;  %2261 = vrcp.f32 %v2867_v40  ;;  %vm707_vm15 = vmor %vm705_vm14, %vm706_vm12 }
 0x1ea   : > { %v2872_v14 = vmul.f32 %v2804_v33, %v797_v50  ;;  %v811_v55 = vsel %vm808_vm11, %v810_v38, %v806_v63  ;;  %v702_v45 = vsub.f32 1.0, %v701_v42  ;;  %2263 = vrcp.f32 %v2869_v41 }
 0x1eb   : > { %v2876_v51 = vmul.f32 %v2802_v15, %v811_v55  ;;  %v688_v1 = vsub.f32 1.0, %v687_v32  ;;  %v709_v57 = vand.u32 2147483647, %v621_v59  ;;  %vm692_vm13 = vweird.f32 %v2260_v49 }
 0x1ec   : > { %v703_v4 = vmul.f32 %v2258_v10, %v702_v45  ;;  %v712_v15 = vor.u32 1.1754944e-38, %v711_v61  ;;  %vm693_vm2 = vmor %vm691_vm0, %vm692_vm13  ;;  %v723_v63 = vand.u32 2147483647, %v2867_v40  ;;  %v725_v42 = vand.u32 2147483648, %v2867_v40 }
 0x1ed   : > { %v689_v33 = vmul.f32 %v2260_v49, %v688_v1  ;;  %vm710_vm1 = vcmp.eq.f32.partialorder %v709_v57, 8.507059e+37  ;;  %v823_v32 = vand.u32 2147483648, %v2869_v41  ;;  %vm719_vm5 = vweird.f32 %v2867_v40 }
 0x1ee   : > { %v704_v7 = vadd.f32 %v2258_v10, %v703_v4  ;;  %vm2903_vm8 = vcmp.eq.f32.partialorder %v723_v63, 8.507059e+37  ;;  %v726_v4 = vor.u32 1.1754944e-38, %v725_v42 }
 0x1ef   : > { %v690_v56 = vadd.f32 %v2260_v49, %v689_v33  ;;  %v2885_v12 = vpop.xlane.xlu1 %624  ;;  %v2262_v13 = vpop.eup %2261 }
 0x1f0   : > { %v2883_v8 = vpop.xlane.xlu0 %640  ;;  %v708_v34 = vsel %vm707_vm15, %v2258_v10, %v704_v7  ;;  %v2264_v35 = vpop.eup %2263  ;;  %v715_v59 = vmul.f32 %v2262_v13, %v2867_v40  ;;  %vm720_vm4 = vweird.f32 %v2262_v13  ;;  %v824_v40 = vor.u32 1.1754944e-38, %v823_v32 }
 0x1f1   : > { %2265 = vrcp.f32 %v2883_v8  ;;  %v713_v9 = vsel %vm710_vm1, %v712_v15, %v708_v34  ;;  %v694_v36 = vsel %vm693_vm2, %v2260_v49, %v690_v56  ;;  %v813_v38 = vmul.f32 %v2264_v35, %v2869_v41  ;;  %vm721_vm9 = vmor %vm719_vm5, %vm720_vm4 }
 0x1f2   : > { %v2890_v37 = vmul.f32 %v2812_v48, %v713_v9  ;;  %v699_v47 = vsel %vm696_vm3, %v698_v6, %v694_v36  ;;  %v716_v10 = vsub.f32 1.0, %v715_v59  ;;  %v821_v49 = vand.u32 2147483647, %v2869_v41 }
 0x1f3   : > { %v2894_v50 = vmul.f32 %v2810_v39, %v699_v47  ;;  %v814_v55 = vsub.f32 1.0, %v813_v38  ;;  %2267 = vrcp.f32 %v2885_v12  ;;  %vm818_vm7 = vweird.f32 %v2264_v35 }
 0x1f4   : > { %v717_v48 = vmul.f32 %v2262_v13, %v716_v10  ;;  %vm822_vm10 = vcmp.eq.f32.partialorder %v821_v49, 8.507059e+37  ;;  %vm819_vm11 = vmor %vm817_vm6, %vm818_vm7  ;;  %v849_v15 = vand.u32 2147483647, %v2883_v8  ;;  %v851_v9 = vand.u32 2147483648, %v2883_v8 }
 0x1f5   : > { %v815_v61 = vmul.f32 %v2264_v35, %v814_v55  ;;  %v737_v10 = vand.u32 2147483647, %v2885_v12  ;;  %vm845_vm13 = vweird.f32 %v2883_v8  ;;  %vm733_vm1 = vweird.f32 %v2885_v12 }
 0x1f6   : > { %v718_v39 = vadd.f32 %v2262_v13, %v717_v48  ;;  %vm850_vm15 = vcmp.eq.f32.partialorder %v849_v15, 8.507059e+37  ;;  %v852_v55 = vor.u32 1.1754944e-38, %v851_v9 }
 0x1f7   : > { %v2266_v45 = vpop.eup %2265  ;;  %v2910_v33 = vpop.xlane.xlu1 %642  ;;  %v816_v11 = vadd.f32 %v2264_v35, %v815_v61  ;;  %vm738_vm2 = vcmp.eq.f32.partialorder %v737_v10, 8.507059e+37 }
 0x1f8   : > { %v841_v57 = vmul.f32 %v2266_v45, %v2883_v8  ;;  %v2908_v54 = vpop.xlane.xlu2 %626  ;;  %v722_v41 = vsel %vm721_vm9, %v2262_v13, %v718_v39  ;;  %vm846_vm12 = vweird.f32 %v2266_v45 }
 0x1f9   : > { %2269 = vrcp.f32 %v2908_v54  ;;  %v2268_v56 = vpop.eup %2267  ;;  %v727_v34 = vsel %vm2903_vm8, %v726_v4, %v722_v41  ;;  %v820_v6 = vsel %vm819_vm11, %v2264_v35, %v816_v11  ;;  %vm847_vm14 = vmor %vm845_vm13, %vm846_vm12  ;;  %vm747_vm6 = vweird.f32 %v2908_v54 }
 0x1fa   : > { %v842_v7 = vsub.f32 1.0, %v841_v57  ;;  %2271 = vrcp.f32 %v2910_v33  ;;  %v2919_v36 = vmul.f32 %v2820_v53, %v727_v34  ;;  %v825_v59 = vsel %vm822_vm10, %v824_v40, %v820_v6 }
 0x1fb   : > { %v729_v13 = vmul.f32 %v2268_v56, %v2885_v12  ;;  %v2923_v38 = vmul.f32 %v2818_v52, %v825_v59  ;;  %v739_v53 = vand.u32 2147483648, %v2885_v12  ;;  %vm734_vm0 = vweird.f32 %v2268_v56 }
 0x1fc   : > { %v843_v47 = vmul.f32 %v2266_v45, %v842_v7  ;;  %vm735_vm3 = vmor %vm733_vm1, %vm734_vm0  ;;  %v753_v40 = vand.u32 2147483648, %v2908_v54  ;;  %v865_v12 = vand.u32 2147483648, %v2910_v33  ;;  %vm859_vm8 = vweird.f32 %v2910_v33 }
 0x1fd   : > { %v730_v42 = vsub.f32 1.0, %v729_v13  ;;  %v740_v11 = vor.u32 1.1754944e-38, %v739_v53 }
 0x1fe   : > { %v844_v63 = vadd.f32 %v2266_v45, %v843_v47  ;;  %v754_v47 = vor.u32 1.1754944e-38, %v753_v40 }
 0x1ff   : > { %v2270_v35 = vpop.eup %2269  ;;  %v731_v48 = vmul.f32 %v2268_v56, %v730_v42 }
 0x200   : > { %v2272_v49 = vpop.eup %2271  ;;  %v848_v32 = vsel %vm847_vm14, %v2266_v45, %v844_v63  ;;  %v743_v61 = vmul.f32 %v2270_v35, %v2908_v54  ;;  %v639_v52 = vpop.xlane.xlu2 %638  ;;  %v751_v45 = vand.u32 2147483647, %v2908_v54  ;;  %vm748_vm4 = vweird.f32 %v2270_v35 }
 0x201   : > { %v853_v39 = vsel %vm850_vm15, %v852_v55, %v848_v32  ;;  %v855_v8 = vmul.f32 %v2272_v49, %v2910_v33  ;;  %v732_v4 = vadd.f32 %v2268_v56, %v731_v48  ;;  %2273 = vrcp.f32 %v639_v52  ;;  %vm749_vm7 = vmor %vm747_vm6, %vm748_vm4 }
 0x202   : > { %v2932_v1 = vmul.f32 %v2828_v62, %v853_v39  ;;  %v744_v57 = vsub.f32 1.0, %v743_v61  ;;  %vm860_vm5 = vweird.f32 %v2272_v49  ;;  %v863_v62 = vand.u32 2147483647, %v2910_v33 }
 0x203   : > { %v856_v41 = vsub.f32 1.0, %v855_v8  ;;  %v736_v7 = vsel %vm735_vm3, %v2268_v56, %v732_v4  ;;  %vm752_vm9 = vcmp.eq.f32.partialorder %v751_v45, 8.507059e+37  ;;  %vm861_vm10 = vmor %vm859_vm8, %vm860_vm5  ;;  %v866_v63 = vor.u32 1.1754944e-38, %v865_v12 }
 0x204   : > { %v745_v15 = vmul.f32 %v2270_v35, %v744_v57  ;;  %v741_v34 = vsel %vm738_vm2, %v740_v11, %v736_v7  ;;  %vm864_vm11 = vcmp.eq.f32.partialorder %v863_v62, 8.507059e+37  ;;  %v837_v61 = vand.u32 2147483648, %v639_v52 }
 0x205   : > { %v857_v6 = vmul.f32 %v2272_v49, %v856_v41  ;;  %v2939_v9 = vmul.f32 %v2826_v60, %v741_v34  ;;  %v835_v33 = vand.u32 2147483647, %v639_v52  ;;  %vm831_vm13 = vweird.f32 %v639_v52 }
 0x206   : > { %v746_v59 = vadd.f32 %v2270_v35, %v745_v15  ;;  %v838_v8 = vor.u32 1.1754944e-38, %v837_v61 }
 0x207   : > { %v858_v13 = vadd.f32 %v2272_v49, %v857_v6  ;;  %v2274_v56 = vpop.eup %2273  ;;  %vm836_vm15 = vcmp.eq.f32.partialorder %v835_v33, 8.507059e+37 }
 0x208   : > { %v750_v10 = vsel %vm749_vm7, %v2270_v35, %v746_v59  ;;  %v827_v53 = vmul.f32 %v2274_v56, %v639_v52  ;;  %vm832_vm12 = vweird.f32 %v2274_v56 }
 0x209   : > { %v755_v42 = vsel %vm752_vm9, %v754_v47, %v750_v10  ;;  %v862_v55 = vsel %vm861_vm10, %v2272_v49, %v858_v13  ;;  %vm833_vm14 = vmor %vm831_vm13, %vm832_vm12 }
 0x20a   : > { %v2944_v60 = vmul.f32 %v2835_v3, %v755_v42  ;;  %v867_v32 = vsel %vm864_vm11, %v866_v63, %v862_v55  ;;  %v828_v48 = vsub.f32 1.0, %v827_v53 }
 0x20b   : > { %v883_v54 = vmul.f32 %v2833_v2, %v867_v32 }
 0x20c   : > { %v829_v39 = vmul.f32 %v2274_v56, %v828_v48 }
 0x20e   : > { %v830_v35 = vadd.f32 %v2274_v56, %v829_v39  ;;  %887 = sbr.rel (%p2019_p6) target bundleno = 548 (0x224), region = 72 }
 0x210   : > { %v834_v4 = vsel %vm833_vm14, %v2274_v56, %v830_v35 }
 0x211   : > { %v839_v49 = vsel %vm836_vm15, %v838_v8, %v834_v4 }
 0x212   : > { %v881_v57 = vmul.f32 %v2839_v46, %v839_v49 }
 0x213   : > { %v2476_v2 = vmov 0.0  }
 0x214   : > { %888 = vst [vmem:[#allocation6] sm:$0xff] %v2476_v2 }
 0x215   : > { %889 = vst [vmem:[#allocation6 + $0x8] sm:$0xff] %v2476_v2 }
 0x216   : > { %890 = vst [vmem:[#allocation6 + $0x10] sm:$0xff] %v2476_v2 }
 0x217   : > { %891 = vst [vmem:[#allocation6 + $0x18] sm:$0xff] %v2476_v2 }
 0x218   : > { %892 = vst [vmem:[#allocation6 + $0x20] sm:$0xff] %v2476_v2 }
 0x219   : > { %893 = vst [vmem:[#allocation6 + $0x28] sm:$0xff] %v2476_v2 }
 0x21a   : > { %894 = vst [vmem:[#allocation6 + $0x30] sm:$0xff] %v2476_v2 }
 0x21b   : > { %895 = vst [vmem:[#allocation6 + $0x38] sm:$0xff] %v2476_v2 }
 0x21c   : > { %896 = vst [vmem:[#allocation6 + $0x40] sm:$0xff] %v2476_v2 }
 0x21d   : > { %897 = vst [vmem:[#allocation6 + $0x48] sm:$0xff] %v2476_v2 }
 0x21e   : > { %898 = vst [vmem:[#allocation6 + $0x50] sm:$0xff] %v2476_v2 }
 0x21f   : > { %899 = vst [vmem:[#allocation6 + $0x58] sm:$0xff] %v2476_v2 }
 0x220   : > { %900 = vst [vmem:[#allocation6 + $0x60] sm:$0xff] %v2476_v2 }
 0x221   : > { %901 = vst [vmem:[#allocation6 + $0x68] sm:$0xff] %v2476_v2 }
 0x222   : > { %902 = vst [vmem:[#allocation6 + $0x70] sm:$0xff] %v2476_v2 }
 0x223   : > { %903 = vst [vmem:[#allocation6 + $0x78] sm:$0xff] %v2476_v2 }
 0x224 PF: > { %v1084_v3 = vld [vmem:[%s3315_s3 + $0x78] sm:$0xff]  ;;  %v1083_v46 = vld [vmem:[%s3315_s3 + $0x70] sm:$0xff]  ;;  %2120 = vmatpush.lsf.msrb.mxu1 %v883_v54  ;;  %v1082_v52 = vld [vmem:[%s3315_s3 + $0x68] sm:$0xff]  ;;  %vm1182_vm0 = vcmask 523264   ;;  %vm1320_vm1 = vcmask 261120   ;;  %s2477_s16 = smov [#allocation6]  }
 0x225   : > { %1089 = vmatpush.msra.mxu2 %v1084_v3  ;;  %v1081_v11 = vld [vmem:[%s3315_s3 + $0x60] sm:$0xff]  ;;  %v1080_v45 = vld [vmem:[%s3315_s3 + $0x58] sm:$0xff]  ;;  %v1078_v41 = vld [vmem:[%s3315_s3 + $0x48] sm:$0xff]  ;;  %s1922_s21 = sshll.u32 %s2477_s16, 4  ;;  %s1924_s26 = sshll.u32 %s3324_s12, 4  ;;  %s1923_s21 = int_to_ptr.vmem [resolvable:$true] %s1922_s21  ;;  %s1925_s26 = int_to_ptr.hbm [resolvable:$true] %s1924_s26 }
 0x226   : > { %952 = vmatpush.msra.mxu1 %v883_v54  ;;  %v1177_v40 = vld [vmem:[%s3317_s5 + $0x38] sm:$0xff]  ;;  %v1071_v15 = vld [vmem:[%s3315_s3 + $0x10] sm:$0xff]  ;;  %v3020_v12 = vld [vmem:[%s3313_s1] ss:$0 sm:$0xff]  ;;  %s2478_s18 = smov 128   ;;  %s2479_s13 = smov 8  }
 0x227   : > { %1090 = vmatpush.msra.mxu2 %v1083_v46  ;;  %2109 = vmatpush.msra.mxu3 %v1177_v40  ;;  %v1076_v7 = vld [vmem:[%s3315_s3 + $0x38] sm:$0xff]  ;;  %v1176_v34 = vld [vmem:[%s3317_s5 + $0x30] sm:$0xff]  ;;  %v1069_v6 = vld [vmem:[%s3315_s3] sm:$0xff]  ;;  %v1053_v62 = vmul.f32 %v3020_v12, %v2695_v16  ;;  %v1063_v59 = vmul.f32 %v3020_v12, %v2714_v21  ;;  %v1065_v47 = vmul.f32 %v3020_v12, %v2730_v25  ;;  %p3346_p7 = scmp.eq.s32.totalorder %s2567_s25, 1  ;;  %s2092_s19 = sshll.u32 %s2567_s25, 7 }
 0x228   : > { %2121 = vmatpush.lsf.msrb.mxu1 %v2932_v1  ;;  %v1175_v16 = vld [vmem:[%s3317_s5 + $0x28] sm:$0xff]  ;;  %v1066_v21 = vmul.f32 %v3020_v12, %v2738_v27  ;;  %v1068_v13 = vmul.f32 %v3020_v12, %v2754_v31  ;;  %v3093_v25 = vld [vmem:[%s3316_s4] ss:$0 sm:$0xff]  ;;  %v1315_v48 = vld [vmem:[%s3319_s7 + $0x18] sm:$0xff]  ;;  %s1907_s14 = scalar_lea.hbm %s3323_s11, %s2092_s19  ;;  %s1908_s17 = sshll.u32 %s2950_s30, 4  ;;  %s1909_s17 = int_to_ptr.vmem [resolvable:$true] %s1908_s17 }
 0x229   : > { %1091 = vmatpush.msra.mxu2 %v1082_v52  ;;  %2110 = vmatpush.msra.mxu3 %v1176_v34  ;;  %v1314_v3 = vld [vmem:[%s3319_s7 + $0x10] sm:$0xff]  ;;  %s1910_s28 = sshll.u32 %s1907_s14, 4  ;;  %s2422_s20 = scalar_lea.hbm %s3323_s11, 256  ;;  %s1911_s28 = int_to_ptr.hbm [resolvable:$true] %s1910_s28 }
 0x22a   : > { %953 = vmatpush.msra.mxu1 %v2932_v1  ;;  %v1079_v1 = vld [vmem:[%s3315_s3 + $0x50] sm:$0xff]  ;;  %s2416_s23 = sshra.s32 %s1911_s28, 4  ;;  %s2417_s23 = int_to_ptr.hbm [resolvable:$true] %s2416_s23 }
 0x22b   : > { %1092 = vmatpush.msra.mxu2 %v1081_v11  ;;  %2111 = vmatpush.msra.mxu3 %v1175_v16  ;;  %s2418_s27 = scalar_lea.hbm %s2417_s23, 128  ;;  %p2423_p1 = scmp.lt.s32.totalorder %s2417_s23, %s3323_s11 }
 0x22c   : > { %2122 = vmatpush.lsf.msrb.mxu1 %v881_v57  ;;  %p2419_p9 = scmp.ne.s32.totalorder %s2417_s23, %s2418_s27  ;;  %p2424_p3 = scmp.lt.s32.totalorder %s2422_s20, %s2418_s27 }
 0x22d   : > { %1093 = vmatpush.msra.mxu2 %v1080_v45 }
 0x22e   : > { %954 = vmatpush.msra.mxu1 %v881_v57  ;;  %p2420_p13 = pnand %p2419_p9, %p2598_p11  ;;  %p2425_p4 = por %p2424_p3, %p2423_p1 }
 0x22f   : > { %1094 = vmatpush.msra.mxu2 %v1079_v1 }
 0x230   : > { %2123 = vmatpush.lsf.msrb.mxu1 %v2923_v38  ;;  %p2421_p0 = pneg %p2420_p13 }
 0x231   : > { %1095 = vmatpush.msra.mxu2 %v1078_v41  ;;  %v1313_v41 = vld [vmem:[%s3319_s7 + $0x8] sm:$0xff] }
 0x232   : > { %955 = vmatpush.msra.mxu1 %v2923_v38  ;;  %v1077_v38 = vld [vmem:[%s3315_s3 + $0x40] sm:$0xff]  ;;  %p2426_p8 = pnand %p2425_p4, %p2421_p0 }
 0x233   : > { %1096 = vmatpush.msra.mxu2 %v1077_v38 }
 0x234   : > { %2124 = vmatpush.lsf.msrb.mxu1 %v2876_v51 }
 0x235   : > { %1097 = vmatpush.msra.mxu2 %v1076_v7 }
 0x236   : > { %2125 = vmatpush.lsf.msrb.mxu1 %v2872_v14 }
 0x238   : > { %956 = vmatpush.msra.mxu1 %v2876_v51  ;;  %v1075_v51 = vld [vmem:[%s3315_s3 + $0x30] sm:$0xff] }
 0x239   : > { %1098 = vmatpush.msra.mxu2 %v1075_v51 }
 0x23a   : > { %2126 = vmatpush.lsf.msrb.mxu1 %v2857_v5 }
 0x23c   : > { %957 = vmatpush.msra.mxu1 %v2872_v14  ;;  %v1074_v14 = vld [vmem:[%s3315_s3 + $0x28] sm:$0xff] }
 0x23d   : > { %1099 = vmatpush.msra.mxu2 %v1074_v14 }
 0x23e   : > { %2127 = vmatpush.lsf.msrb.mxu1 %v2843_v44 }
 0x240   : > { %958 = vmatpush.msra.mxu1 %v2857_v5  ;;  %v1073_v5 = vld [vmem:[%s3315_s3 + $0x20] sm:$0xff] }
 0x241   : > { %1100 = vmatpush.msra.mxu2 %v1073_v5 }
 0x242   : > { %2128 = vmatpush.lsf.msrb.mxu1 %v2944_v60 }
 0x244   : > { %959 = vmatpush.msra.mxu1 %v2843_v44  ;;  %v1072_v44 = vld [vmem:[%s3315_s3 + $0x18] sm:$0xff] }
 0x245   : > { %1101 = vmatpush.msra.mxu2 %v1072_v44 }
 0x246   : > { %2129 = vmatpush.lsf.msrb.mxu1 %v2939_v9 }
 0x247   : > { %1102 = vmatpush.msra.mxu2 %v1071_v15 }
 0x248   : > { %960 = vmatpush.msra.mxu1 %v2944_v60 }
 0x24a   : > { %2130 = vmatpush.lsf.msrb.mxu1 %v2919_v36 }
 0x24c   : > { %961 = vmatpush.msra.mxu1 %v2939_v9  ;;  %v1061_v9 = vmul.f32 %v3020_v12, %v2698_v17  ;;  %v1064_v17 = vmul.f32 %v3020_v12, %v2722_v23  ;;  %v1067_v23 = vmul.f32 %v3020_v12, %v2746_v29 }
 0x24e   : > { %2131 = vmatpush.lsf.msrb.mxu1 %v2890_v37 }
 0x250   : > { %962 = vmatpush.msra.mxu1 %v2919_v36  ;;  %v1070_v36 = vld [vmem:[%s3315_s3 + $0x8] sm:$0xff] }
 0x251   : > { %1103 = vmatpush.msra.mxu2 %v1070_v36  ;;  %v1312_v36 = vld [vmem:[%s3319_s7] sm:$0xff] }
 0x252   : > { %2132 = vmatpush.lsf.msrb.mxu1 %v2894_v50 }
 0x253   : > { %1104 = vmatpush.msra.mxu2 %v1069_v6 }
 0x254   : > { %2133 = vmatpush.lsf.msrb.mxu1 %v2861_v43  ;;  %1105 = vmatmul.f32.vlgmr.msra.gmra.mxu2 %v1053_v62 }
 0x255   : > { %1239 = vmatpush.msrb.mxu2 %v1177_v40 }
 0x256   : > { %963 = vmatpush.msra.mxu1 %v2890_v37  ;;  %v1054_v37 = vmul.f32 %v3020_v12, %v2703_v18  ;;  %v1174_v18 = vld [vmem:[%s3317_s5 + $0x20] sm:$0xff] }
 0x257   : > { %1240 = vmatpush.msrb.mxu2 %v1176_v34  ;;  %2112 = vmatpush.msra.mxu3 %v1174_v18 }
 0x258   : > { %2134 = vmatpush.lsf.msrb.mxu1 %v2851_v58 }
 0x259   : > { %1241 = vmatpush.msrb.mxu2 %v1175_v16 }
 0x25a   : > { %964 = vmatpush.msra.mxu1 %v2894_v50  ;;  %v1055_v50 = vmul.f32 %v3020_v12, %v2711_v20  ;;  %v1173_v20 = vld [vmem:[%s3317_s5 + $0x18] sm:$0xff] }
 0x25b   : > { %1242 = vmatpush.msrb.mxu2 %v1174_v18  ;;  %2113 = vmatpush.msra.mxu3 %v1173_v20 }
 0x25c   : > { %2135 = vmatpush.lsf.msrb.mxu1 %v2846_v0  ;;  %1108 = vmatmul.f32.gmra.mxu2 %v1054_v37 }
 0x25d   : > { %2136 = vllmr.16.mxu1  ;;  %1243 = vmatpush.msrb.mxu2 %v1173_v20 }
 0x25e   : > { %965 = vmatpush.msra.mxu1 %v2861_v43  ;;  %v1058_v43 = vmul.f32 %v3020_v12, %v2735_v26  ;;  %v1172_v26 = vld [vmem:[%s3317_s5 + $0x10] sm:$0xff] }
 0x25f   : > { %1244 = vmatpush.msrb.mxu2 %v1172_v26  ;;  %2114 = vmatpush.msra.mxu3 %v1172_v26  ;;  %v3142_v26 = vld [vmem:[%s3318_s6] ss:$0 sm:$0xff] }
 0x260   : > { %966 = vmatpush.msra.mxu1 %v2851_v58  ;;  %v1056_v58 = vmul.f32 %v3020_v12, %v2719_v22  ;;  %v1059_v22 = vmul.f32 %v3020_v12, %v2743_v28  ;;  %v1062_v28 = vmul.f32 %v3020_v12, %v2706_v19  ;;  %v1170_v19 = vld [vmem:[%s3317_s5] sm:$0xff] }
 0x262   : > { %967 = vmatpush.msra.mxu1 %v2846_v0  ;;  %v1057_v0 = vmul.f32 %v3020_v12, %v2727_v24  ;;  %v1060_v24 = vmul.f32 %v3020_v12, %v2751_v30  ;;  %v1171_v30 = vld [vmem:[%s3317_s5 + $0x8] sm:$0xff] }
 0x263   : > { %1245 = vmatpush.msrb.mxu2 %v1171_v30  ;;  %2115 = vmatpush.msra.mxu3 %v1171_v30 }
 0x264   : > { %1111 = vmatmul.f32.gmra.mxu2 %v1055_v50 }
 0x265   : > { %1246 = vmatpush.msrb.mxu2 %v1170_v19  ;;  %2116 = vmatpush.msra.mxu3 %v1170_v19 }
 0x267   : > { %1381 = vmatpush.msrb.mxu3 %v1315_v48 }
 0x269   : > { %1382 = vmatpush.msrb.mxu3 %v1314_v3 }
 0x26b   : > { %1383 = vmatpush.msrb.mxu3 %v1313_v41 }
 0x26c   : > { %1114 = vmatmul.f32.gmra.mxu2 %v1056_v58 }
 0x26d   : > { %1384 = vmatpush.msrb.mxu3 %v1312_v36 }
 0x274   : > { %1117 = vmatmul.f32.gmra.mxu2 %v1057_v0 }
 0x27c   : > { %1120 = vmatmul.f32.gmra.mxu2 %v1058_v43 }
 0x27e   : > { %2137 = vmatmul.lmr.bf16.vlgmr.msra.gmra.16.mxu1 }
 0x284   : > { %1123 = vmatmul.f32.gmra.mxu2 %v1059_v22 }
 0x286   : > { %2138 = vmatmul.lmr.bf16.gmra.16.mxu1 }
 0x28c   : > { %1126 = vmatmul.f32.gmra.mxu2 %v1060_v24 }
 0x28e   : > { %2139 = vmatmul.lmr.bf16.gmra.16.mxu1 }
 0x294   : > { %1129 = vmatmul.f32.gmra.mxu2 %v1061_v9 }
 0x296   : > { %2140 = vmatmul.lmr.bf16.gmra.16.mxu1 }
 0x29c   : > { %1132 = vmatmul.f32.gmra.mxu2 %v1062_v28 }
 0x29e   : > { %2141 = vmatmul.lmr.bf16.gmra.16.mxu1 }
 0x2a4   : > { %1135 = vmatmul.f32.gmra.mxu2 %v1063_v59 }
 0x2a6   : > { %2142 = vmatmul.lmr.bf16.gmra.16.mxu1 }
 0x2ac   : > { %1138 = vmatmul.f32.gmra.mxu2 %v1064_v17 }
 0x2ae   : > { %2143 = vmatmul.lmr.bf16.gmra.16.mxu1 }
 0x2b4   : > { %1141 = vmatmul.f32.gmra.mxu2 %v1065_v47 }
 0x2b6   : > { %2144 = vmatmul.lmr.bf16.gmra.16.mxu1 }
 0x2bc   : > { %1144 = vmatmul.f32.gmra.mxu2 %v1066_v21 }
 0x2be   : > { %2145 = vmatmul.lmr.bf16.gmra.16.mxu1 }
 0x2c4   : > { %1147 = vmatmul.f32.gmra.mxu2 %v1067_v23 }
 0x2c6   : > { %2146 = vmatmul.lmr.bf16.gmra.16.mxu1 }
 0x2cc   : > { %1150 = vmatmul.f32.gmra.mxu2 %v1068_v13 }
 0x2ce   : > { %2147 = vmatmul.lmr.bf16.gmra.16.mxu1 }
 0x2d6   : > { %2148 = vmatmul.lmr.bf16.gmra.16.mxu1 }
 0x2d7   : > { %v1106_v56 = vpop.f32.mrf.mxu2 }
 0x2d8   : > { %v1107_v27 = vadd.f32 %v3093_v25, %v1106_v56 }
 0x2da   : > { %v1154_v10 = vmax.f32 %v1107_v27, 0.0 }
 0x2dc   : > { %2020 = vmatmul.msk.f32.vlgmr.msrb.gmra.mxu2 %vm1182_vm0, %v1154_v10 }
 0x2de   : > { %2149 = vmatmul.lmr.bf16.gmra.16.mxu1 }
 0x2df   : > { %v1109_v29 = vpop.f32.mrf.mxu2 }
 0x2e0   : > { %v1110_v63 = vadd.f32 %v3093_v25, %v1109_v29 }
 0x2e2   : > { %v1155_v31 = vmax.f32 %v1110_v63, 0.0 }
 0x2e4   : > { %2021 = vmatmul.msk.f32.gmra.mxu2 %vm1182_vm0, %v1155_v31 }
 0x2e6   : > { %2150 = vmatmul.lmr.bf16.gmra.16.mxu1 }
 0x2e7   : > { %v1112_v42 = vpop.f32.mrf.mxu2 }
 0x2e8   : > { %v1113_v55 = vadd.f32 %v3093_v25, %v1112_v42 }
 0x2ea   : > { %v1156_v53 = vmax.f32 %v1113_v55, 0.0 }
 0x2ec   : > { %2022 = vmatmul.msk.f32.gmra.mxu2 %vm1182_vm0, %v1156_v53 }
 0x2ee   : > { %2151 = vmatmul.lmr.bf16.gmra.16.mxu1 }
 0x2ef   : > { %v1115_v60 = vpop.f32.mrf.mxu2 }
 0x2f0   : > { %v1116_v32 = vadd.f32 %v3093_v25, %v1115_v60 }
 0x2f2   : > { %v1157_v54 = vmax.f32 %v1116_v32, 0.0 }
 0x2f4   : > { %2023 = vmatmul.msk.f32.gmra.mxu2 %vm1182_vm0, %v1157_v54 }
 0x2f6   : > { %2152 = vmatmul.lmr.bf16.gmra.16.mxu1 }
 0x2f7   : > { %v1118_v61 = vpop.f32.mrf.mxu2 }
 0x2f8   : > { %v1119_v39 = vadd.f32 %v3093_v25, %v1118_v61 }
 0x2fa   : > { %v1158_v33 = vmax.f32 %v1119_v39, 0.0 }
 0x2fc   : > { %2024 = vmatmul.msk.f32.gmra.mxu2 %vm1182_vm0, %v1158_v33 }
 0x2ff   : > { %v1121_v35 = vpop.f32.mrf.mxu2 }
 0x300   : > { %v1122_v8 = vadd.f32 %v3093_v25, %v1121_v35 }
 0x302   : > { %v1159_v4 = vmax.f32 %v1122_v8, 0.0 }
 0x304   : > { %2025 = vmatmul.msk.f32.gmra.mxu2 %vm1182_vm0, %v1159_v4 }
 0x307   : > { %v1124_v49 = vpop.f32.mrf.mxu2 }
 0x308   : > { %v1125_v57 = vadd.f32 %v3093_v25, %v1124_v49 }
 0x30a   : > { %v1160_v2 = vmax.f32 %v1125_v57, 0.0 }
 0x30c   : > { %2026 = vmatmul.msk.f32.vlgmr.msra.gmra.mxu3 %vm1182_vm0, %v1160_v2 }
 0x30f   : > { %v1127_v46 = vpop.f32.mrf.mxu2 }
 0x310   : > { %v1128_v52 = vadd.f32 %v3093_v25, %v1127_v46 }
 0x312   : > { %v1161_v11 = vmax.f32 %v1128_v52, 0.0 }
 0x314   : > { %2027 = vmatmul.msk.f32.gmra.mxu3 %vm1182_vm0, %v1161_v11  ;;  %v1457_v11 = vld [vmem:[%s3321_s9 + $0x38] sm:$0xff] }
 0x315   : > { %1518 = vmatpush.msrb.mxu0 %v1457_v11 }
 0x317   : > { %v1130_v45 = vpop.f32.mrf.mxu2 }
 0x318   : > { %v1131_v1 = vadd.f32 %v3093_v25, %v1130_v45  ;;  %v1456_v45 = vld [vmem:[%s3321_s9 + $0x30] sm:$0xff] }
 0x319   : > { %1519 = vmatpush.msrb.mxu0 %v1456_v45 }
 0x31a   : > { %v1162_v40 = vmax.f32 %v1131_v1, 0.0  ;;  %v1455_v1 = vld [vmem:[%s3321_s9 + $0x28] sm:$0xff] }
 0x31b   : > { %1520 = vmatpush.msrb.mxu0 %v1455_v1 }
 0x31c   : > { %2028 = vmatmul.msk.f32.gmra.mxu3 %vm1182_vm0, %v1162_v40 }
 0x31f   : > { %v1133_v38 = vpop.f32.mrf.mxu2 }
 0x320   : > { %v1134_v7 = vadd.f32 %v3093_v25, %v1133_v38  ;;  %v1454_v38 = vld [vmem:[%s3321_s9 + $0x20] sm:$0xff] }
 0x321   : > { %1521 = vmatpush.msrb.mxu0 %v1454_v38  ;;  %v3222_v38 = vld [vmem:[%s3322_s10] ss:$0 sm:$0xff] }
 0x322   : > { %v1163_v51 = vmax.f32 %v1134_v7, 0.0 }
 0x324   : > { %2029 = vmatmul.msk.f32.gmra.mxu3 %vm1182_vm0, %v1163_v51  ;;  %v1453_v51 = vld [vmem:[%s3321_s9 + $0x18] sm:$0xff] }
 0x325   : > { %1522 = vmatpush.msrb.mxu0 %v1453_v51  ;;  %v969_v51 = vpop.f32.mrf.mxu1 }
 0x327   : > { %v1136_v14 = vpop.f32.mrf.mxu2 }
 0x328   : > { %v1137_v5 = vadd.f32 %v3093_v25, %v1136_v14  ;;  %v1452_v14 = vld [vmem:[%s3321_s9 + $0x10] sm:$0xff] }
 0x329   : > { %1523 = vmatpush.msrb.mxu0 %v1452_v14 }
 0x32a   : > { %v1164_v44 = vmax.f32 %v1137_v5, 0.0 }
 0x32c   : > { %2030 = vmatmul.msk.f32.gmra.mxu3 %vm1182_vm0, %v1164_v44 }
 0x32f   : > { %v1139_v15 = vpop.f32.mrf.mxu2 }
 0x330   : > { %v1140_v12 = vadd.f32 %v3093_v25, %v1139_v15  ;;  %v1451_v15 = vld [vmem:[%s3321_s9 + $0x8] sm:$0xff] }
 0x331   : > { %1524 = vmatpush.msrb.mxu0 %v1451_v15 }
 0x332   : > { %v1165_v34 = vmax.f32 %v1140_v12, 0.0 }
 0x334   : > { %2031 = vmatmul.msk.f32.gmra.mxu3 %vm1182_vm0, %v1165_v34  ;;  %v1450_v34 = vld [vmem:[%s3321_s9] sm:$0xff] }
 0x335   : > { %1525 = vmatpush.msrb.mxu0 %v1450_v34  ;;  %v972_v34 = vpop.f32.mrf.mxu1 }
 0x337   : > { %v1142_v6 = vpop.f32.mrf.mxu2 }
 0x338   : > { %v1143_v62 = vadd.f32 %v3093_v25, %v1142_v6 }
 0x33a   : > { %v1166_v37 = vmax.f32 %v1143_v62, 0.0 }
 0x33c   : > { %2032 = vmatmul.msk.f32.gmra.mxu3 %vm1182_vm0, %v1166_v37 }
 0x33f   : > { %v1145_v16 = vpop.f32.mrf.mxu2 }
 0x340   : > { %v1146_v50 = vadd.f32 %v3093_v25, %v1145_v16 }
 0x342   : > { %v1167_v58 = vmax.f32 %v1146_v50, 0.0 }
 0x344   : > { %2033 = vmatmul.msk.f32.gmra.mxu3 %vm1182_vm0, %v1167_v58  ;;  %v2278_v58 = vld [vmem:[%s3320_s8] ss:$0 sm:$0xff] }
 0x347   : > { %v1148_v18 = vpop.f32.mrf.mxu2 }
 0x348   : > { %v1149_v0 = vadd.f32 %v3093_v25, %v1148_v18 }
 0x34a   : > { %v1168_v43 = vmax.f32 %v1149_v0, 0.0 }
 0x34c   : > { %2034 = vmatmul.msk.f32.gmra.mxu3 %vm1182_vm0, %v1168_v43 }
 0x34f   : > { %v1151_v20 = vpop.f32.mrf.mxu2 }
 0x350   : > { %v1152_v22 = vadd.f32 %v3093_v25, %v1151_v20 }
 0x352   : > { %v1169_v24 = vmax.f32 %v1152_v22, 0.0 }
 0x354   : > { %2035 = vmatmul.msk.f32.gmra.mxu3 %vm1182_vm0, %v1169_v24 }
 0x35f   : > { %v1248_v9 = vpop.f32.mrf.mxu2 }
 0x360   : > { %v1249_v28 = vadd.f32 %v3142_v26, %v1248_v9 }
 0x362   : > { %v1296_v30 = vmax.f32 %v1249_v28, 0.0 }
 0x364   : > { %2036 = vmatmul.msk.f32.vlgmr.msrb.gmra.mxu3 %vm1320_vm1, %v1296_v30 }
 0x367   : > { %v1251_v59 = vpop.f32.mrf.mxu2 }
 0x368   : > { %v1252_v17 = vadd.f32 %v3142_v26, %v1251_v59 }
 0x36a   : > { %v1297_v19 = vmax.f32 %v1252_v17, 0.0 }
 0x36c   : > { %2037 = vmatmul.msk.f32.gmra.mxu3 %vm1320_vm1, %v1297_v19 }
 0x36f   : > { %v1254_v47 = vpop.f32.mrf.mxu2 }
 0x370   : > { %v1255_v21 = vadd.f32 %v3142_v26, %v1254_v47 }
 0x372   : > { %v1298_v23 = vmax.f32 %v1255_v21, 0.0 }
 0x374   : > { %2038 = vmatmul.msk.f32.gmra.mxu3 %vm1320_vm1, %v1298_v23 }
 0x377   : > { %v1257_v13 = vpop.f32.mrf.mxu2 }
 0x378   : > { %v1258_v25 = vadd.f32 %v3142_v26, %v1257_v13 }
 0x37a   : > { %v1299_v56 = vmax.f32 %v1258_v25, 0.0 }
 0x37c   : > { %2039 = vmatmul.msk.f32.gmra.mxu3 %vm1320_vm1, %v1299_v56 }
 0x37f   : > { %v1260_v27 = vpop.f32.mrf.mxu2 }
 0x380   : > { %v1261_v10 = vadd.f32 %v3142_v26, %v1260_v27 }
 0x382   : > { %v1300_v29 = vmax.f32 %v1261_v10, 0.0 }
 0x384   : > { %2040 = vmatmul.msk.f32.gmra.mxu3 %vm1320_vm1, %v1300_v29 }
 0x387   : > { %v1263_v63 = vpop.f32.mrf.mxu2 }
 0x388   : > { %v1264_v31 = vadd.f32 %v3142_v26, %v1263_v63 }
 0x38a   : > { %v1301_v42 = vmax.f32 %v1264_v31, 0.0 }
 0x38c   : > { %2041 = vmatmul.msk.f32.gmra.mxu3 %vm1320_vm1, %v1301_v42 }
 0x38f   : > { %v1266_v55 = vpop.f32.mrf.mxu3 }
 0x390   : > { %v1267_v53 = vadd.f32 %v3142_v26, %v1266_v55 }
 0x392   : > { %v1302_v60 = vmax.f32 %v1267_v53, 0.0 }
 0x394   : > { %2042 = vmatmul.msk.f32.gmra.mxu3 %vm1320_vm1, %v1302_v60 }
 0x397   : > { %v1269_v32 = vpop.f32.mrf.mxu3 }
 0x398   : > { %v1270_v54 = vadd.f32 %v3142_v26, %v1269_v32 }
 0x39a   : > { %v1303_v48 = vmax.f32 %v1270_v54, 0.0 }
 0x39c   : > { %2043 = vmatmul.msk.f32.gmra.mxu3 %vm1320_vm1, %v1303_v48 }
 0x39f   : > { %v1272_v61 = vpop.f32.mrf.mxu3 }
 0x3a0   : > { %v1273_v39 = vadd.f32 %v3142_v26, %v1272_v61 }
 0x3a2   : > { %v1304_v33 = vmax.f32 %v1273_v39, 0.0 }
 0x3a4   : > { %2044 = vmatmul.msk.f32.gmra.mxu3 %vm1320_vm1, %v1304_v33 }
 0x3a7   : > { %v1275_v35 = vpop.f32.mrf.mxu3 }
 0x3a8   : > { %v1276_v8 = vadd.f32 %v3142_v26, %v1275_v35 }
 0x3aa   : > { %v1305_v4 = vmax.f32 %v1276_v8, 0.0 }
 0x3ac   : > { %2045 = vmatmul.msk.f32.gmra.mxu3 %vm1320_vm1, %v1305_v4 }
 0x3af   : > { %v1278_v49 = vpop.f32.mrf.mxu3 }
 0x3b0   : > { %v1279_v57 = vadd.f32 %v3142_v26, %v1278_v49 }
 0x3b2   : > { %v1306_v2 = vmax.f32 %v1279_v57, 0.0 }
 0x3b4   : > { %2046 = vmatmul.msk.f32.gmra.mxu3 %vm1320_vm1, %v1306_v2 }
 0x3b7   : > { %v1281_v3 = vpop.f32.mrf.mxu3 }
 0x3b8   : > { %v1282_v46 = vadd.f32 %v3142_v26, %v1281_v3 }
 0x3ba   : > { %v1307_v52 = vmax.f32 %v1282_v46, 0.0 }
 0x3bc   : > { %2047 = vmatmul.msk.f32.gmra.mxu3 %vm1320_vm1, %v1307_v52 }
 0x3bf   : > { %v1284_v40 = vpop.f32.mrf.mxu3 }
 0x3c0   : > { %v1285_v41 = vadd.f32 %v3142_v26, %v1284_v40 }
 0x3c2   : > { %v1308_v7 = vmax.f32 %v1285_v41, 0.0 }
 0x3c4   : > { %2048 = vmatmul.msk.f32.gmra.mxu3 %vm1320_vm1, %v1308_v7  ;;  %v904_v7 = vld [vmem:[#allocation6] sm:$0xff] }
 0x3c5   : > { %v1017_v14 = vadd.f32 %v969_v51, %v904_v7 }
 0x3c7   : > { %v1287_v5 = vpop.f32.mrf.mxu3  ;;  %1033 = vst [vmem:[#allocation6] sm:$0xff] %v1017_v14 }
 0x3c8   : > { %v1288_v44 = vadd.f32 %v3142_v26, %v1287_v5 }
 0x3ca   : > { %v1309_v12 = vmax.f32 %v1288_v44, 0.0 }
 0x3cc   : > { %2049 = vmatmul.msk.f32.gmra.mxu3 %vm1320_vm1, %v1309_v12  ;;  %v905_v12 = vld [vmem:[#allocation6 + $0x8] sm:$0xff] }
 0x3cf   : > { %v1290_v36 = vpop.f32.mrf.mxu3 }
 0x3d0   : > { %v1291_v6 = vadd.f32 %v3142_v26, %v1290_v36  ;;  %v1018_v36 = vadd.f32 %v972_v34, %v905_v12 }
 0x3d2   : > { %v1310_v62 = vmax.f32 %v1291_v6, 0.0  ;;  %1034 = vst [vmem:[#allocation6 + $0x8] sm:$0xff] %v1018_v36 }
 0x3d4   : > { %2050 = vmatmul.msk.f32.gmra.mxu3 %vm1320_vm1, %v1310_v62 }
 0x3d7   : > { %v1293_v37 = vpop.f32.mrf.mxu3 }
 0x3d8   : > { %v1294_v16 = vadd.f32 %v3142_v26, %v1293_v37 }
 0x3da   : > { %v1311_v50 = vmax.f32 %v1294_v16, 0.0 }
 0x3dc   : > { %2051 = vmatmul.msk.f32.gmra.mxu3 %vm1320_vm1, %v1311_v50 }
 0x3e7   : > { %v1386_v18 = vpop.f32.mrf.mxu3 }
 0x3e8   : > { %v1387_v0 = vadd.f32 %v2278_v58, %v1386_v18  ;;  %v975_v18 = vpop.f32.mrf.mxu1 }
 0x3ea   : > { %v1434_v43 = vmax.f32 %v1387_v0, 0.0 }
 0x3ec   : > { %2052 = vmatmul.msk.f32.vlgmr.msrb.gmra.mxu0 %vm1182_vm0, %v1434_v43 }
 0x3ef   : > { %v1389_v20 = vpop.f32.mrf.mxu3 }
 0x3f0   : > { %v1390_v22 = vadd.f32 %v2278_v58, %v1389_v20 }
 0x3f2   : > { %v1435_v24 = vmax.f32 %v1390_v22, 0.0 }
 0x3f4   : > { %2053 = vmatmul.msk.f32.gmra.mxu0 %vm1182_vm0, %v1435_v24 }
 0x3f7   : > { %v1392_v9 = vpop.f32.mrf.mxu3 }
 0x3f8   : > { %v1393_v28 = vadd.f32 %v2278_v58, %v1392_v9 }
 0x3fa   : > { %v1436_v26 = vmax.f32 %v1393_v28, 0.0 }
 0x3fc   : > { %2054 = vmatmul.msk.f32.gmra.mxu0 %vm1182_vm0, %v1436_v26 }
 0x3ff   : > { %v1395_v30 = vpop.f32.mrf.mxu3 }
 0x400   : > { %v1396_v59 = vadd.f32 %v2278_v58, %v1395_v30  ;;  %v907_v30 = vld [vmem:[#allocation6 + $0x18] sm:$0xff] }
 0x402   : > { %v1437_v17 = vmax.f32 %v1396_v59, 0.0  ;;  %v978_v59 = vpop.f32.mrf.mxu1 }
 0x404   : > { %2055 = vmatmul.msk.f32.gmra.mxu0 %vm1182_vm0, %v1437_v17 }
 0x407   : > { %v1398_v19 = vpop.f32.mrf.mxu3 }
 0x408   : > { %v1399_v47 = vadd.f32 %v2278_v58, %v1398_v19  ;;  %v1020_v19 = vadd.f32 %v978_v59, %v907_v30 }
 0x40a   : > { %v1438_v21 = vmax.f32 %v1399_v47, 0.0  ;;  %1036 = vst [vmem:[#allocation6 + $0x18] sm:$0xff] %v1020_v19 }
 0x40c   : > { %2056 = vmatmul.msk.f32.gmra.mxu0 %vm1182_vm0, %v1438_v21 }
 0x40f   : > { %v1401_v23 = vpop.f32.mrf.mxu3 }
 0x410   : > { %v1402_v13 = vadd.f32 %v2278_v58, %v1401_v23 }
 0x412   : > { %v1439_v25 = vmax.f32 %v1402_v13, 0.0 }
 0x414   : > { %2057 = vmatmul.msk.f32.gmra.mxu0 %vm1182_vm0, %v1439_v25 }
 0x417   : > { %v1404_v56 = vpop.f32.mrf.mxu3 }
 0x418   : > { %v1405_v27 = vadd.f32 %v2278_v58, %v1404_v56 }
 0x41a   : > { %v1440_v10 = vmax.f32 %v1405_v27, 0.0 }
 0x41c   : > { %2058 = vmatmul.msk.f32.gmra.mxu0 %vm1182_vm0, %v1440_v10 }
 0x41f   : > { %v1407_v29 = vpop.f32.mrf.mxu3 }
 0x420   : > { %v1408_v63 = vadd.f32 %v2278_v58, %v1407_v29 }
 0x422   : > { %v1441_v31 = vmax.f32 %v1408_v63, 0.0 }
 0x424   : > { %2059 = vmatmul.msk.f32.gmra.mxu0 %vm1182_vm0, %v1441_v31 }
 0x427   : > { %v1410_v42 = vpop.f32.mrf.mxu3 }
 0x428   : > { %v1411_v55 = vadd.f32 %v2278_v58, %v1410_v42 }
 0x42a   : > { %v1442_v53 = vmax.f32 %v1411_v55, 0.0 }
 0x42c   : > { %2060 = vmatmul.msk.f32.gmra.mxu0 %vm1182_vm0, %v1442_v53  ;;  %v908_v53 = vld [vmem:[#allocation6 + $0x20] sm:$0xff] }
 0x42f   : > { %v1413_v60 = vpop.f32.mrf.mxu3 }
 0x430   : > { %v1414_v32 = vadd.f32 %v2278_v58, %v1413_v60  ;;  %v981_v60 = vpop.f32.mrf.mxu1 }
 0x432   : > { %v1443_v54 = vmax.f32 %v1414_v32, 0.0 }
 0x434   : > { %2061 = vmatmul.msk.f32.gmra.mxu0 %vm1182_vm0, %v1443_v54 }
 0x437   : > { %v1416_v48 = vpop.f32.mrf.mxu3 }
 0x438   : > { %v1417_v61 = vadd.f32 %v2278_v58, %v1416_v48  ;;  %v1021_v48 = vadd.f32 %v981_v60, %v908_v53 }
 0x43a   : > { %v1444_v39 = vmax.f32 %v1417_v61, 0.0  ;;  %1037 = vst [vmem:[#allocation6 + $0x20] sm:$0xff] %v1021_v48 }
 0x43c   : > { %2062 = vmatmul.msk.f32.gmra.mxu0 %vm1182_vm0, %v1444_v39 }
 0x43f   : > { %v1419_v33 = vpop.f32.mrf.mxu3 }
 0x440   : > { %v1420_v35 = vadd.f32 %v2278_v58, %v1419_v33 }
 0x442   : > { %v1445_v8 = vmax.f32 %v1420_v35, 0.0 }
 0x444   : > { %2063 = vmatmul.msk.f32.gmra.mxu0 %vm1182_vm0, %v1445_v8 }
 0x447   : > { %v1422_v4 = vpop.f32.mrf.mxu3 }
 0x448   : > { %v1423_v49 = vadd.f32 %v2278_v58, %v1422_v4 }
 0x44a   : > { %v1446_v57 = vmax.f32 %v1423_v49, 0.0 }
 0x44c   : > { %2064 = vmatmul.msk.f32.gmra.mxu0 %vm1182_vm0, %v1446_v57 }
 0x44f   : > { %v1425_v2 = vpop.f32.mrf.mxu3 }
 0x450   : > { %v1426_v3 = vadd.f32 %v2278_v58, %v1425_v2 }
 0x452   : > { %v1447_v46 = vmax.f32 %v1426_v3, 0.0 }
 0x454   : > { %2065 = vmatmul.msk.f32.gmra.mxu0 %vm1182_vm0, %v1447_v46 }
 0x457   : > { %v1428_v52 = vpop.f32.mrf.mxu3 }
 0x458   : > { %v1429_v11 = vadd.f32 %v2278_v58, %v1428_v52 }
 0x45a   : > { %v1448_v45 = vmax.f32 %v1429_v11, 0.0 }
 0x45c   : > { %2066 = vmatmul.msk.f32.gmra.mxu0 %vm1182_vm0, %v1448_v45  ;;  %v909_v45 = vld [vmem:[#allocation6 + $0x28] sm:$0xff] }
 0x45f   : > { %v1431_v1 = vpop.f32.mrf.mxu3 }
 0x460   : > { %v1432_v40 = vadd.f32 %v2278_v58, %v1431_v1  ;;  %v906_v58 = vld [vmem:[#allocation6 + $0x10] sm:$0xff]  ;;  %v984_v1 = vpop.f32.mrf.mxu1 }
 0x461   : > { %v1019_v0 = vadd.f32 %v975_v18, %v906_v58  ;;  %v1022_v7 = vadd.f32 %v984_v1, %v909_v45  ;;  %v910_v58 = vld [vmem:[#allocation6 + $0x30] sm:$0xff] }
 0x462   : > { %v1449_v41 = vmax.f32 %v1432_v40, 0.0 }
 0x463   : > { %1035 = vst [vmem:[#allocation6 + $0x10] sm:$0xff] %v1019_v0 }
 0x464   : > { %2067 = vmatmul.msk.f32.gmra.mxu0 %vm1182_vm0, %v1449_v41  ;;  %1038 = vst [vmem:[#allocation6 + $0x28] sm:$0xff] %v1022_v7 }
 0x468   : > { %v987_v18 = vpop.f32.mrf.mxu1 }
 0x469   : > { %v1527_v5 = vpop.f32.mrf.mxu0 }
 0x46a   : > { %v1528_v44 = vadd.f32 %v3222_v38, %v1527_v5 }
 0x46c   : > { %v2068_v15 = vmul.f32 -1.442695, %v1528_v44 }
 0x46e   : > { %2280 = vpow2.f32 %v2068_v15 }
 0x471   : > { %v1530_v6 = vpop.f32.mrf.mxu0 }
 0x472   : > { %v1531_v62 = vadd.f32 %v3222_v38, %v1530_v6 }
 0x474   : > { %v2281_v37 = vpop.eup %2280  ;;  %v2069_v16 = vmul.f32 -1.442695, %v1531_v62 }
 0x475   : > { %v1623_v50 = vadd.f32 1.0, %v2281_v37 }
 0x476   : > { %2282 = vpow2.f32 %v2069_v16 }
 0x477   : > { %2284 = vrcp.f32 %v1623_v50  ;;  %v1650_v47 = vand.u32 2147483648, %v1623_v50  ;;  %v1648_v13 = vand.u32 2147483647, %v1623_v50  ;;  %vm1644_vm3 = vweird.f32 %v1623_v50 }
 0x479   : > { %v1533_v43 = vpop.f32.mrf.mxu0  ;;  %v1651_v63 = vor.u32 1.1754944e-38, %v1650_v47  ;;  %vm1649_vm5 = vcmp.eq.f32.partialorder %v1648_v13, 8.507059e+37 }
 0x47a   : > { %v1534_v20 = vadd.f32 %v3222_v38, %v1533_v43 }
 0x47c   : > { %v2283_v22 = vpop.eup %2282  ;;  %v2070_v24 = vmul.f32 -1.442695, %v1534_v20  ;;  %v1023_v20 = vadd.f32 %v987_v18, %v910_v58 }
 0x47d   : > { %v2285_v9 = vpop.eup %2284  ;;  %v1624_v28 = vadd.f32 1.0, %v2283_v22 }
 0x47e   : > { %v1640_v26 = vmul.f32 %v2285_v9, %v1623_v50  ;;  %2286 = vpow2.f32 %v2070_v24  ;;  %vm1645_vm2 = vweird.f32 %v2285_v9  ;;  %1039 = vst [vmem:[#allocation6 + $0x30] sm:$0xff] %v1023_v20 }
 0x47f   : > { %2288 = vrcp.f32 %v1624_v28  ;;  %vm1646_vm4 = vmor %vm1644_vm3, %vm1645_vm2  ;;  %v1665_v61 = vand.u32 2147483648, %v1624_v28  ;;  %v1663_v35 = vand.u32 2147483647, %v1624_v28  ;;  %vm1659_vm7 = vweird.f32 %v1624_v28 }
 0x480   : > { %v1641_v17 = vsub.f32 1.0, %v1640_v26 }
 0x481   : > { %v1536_v21 = vpop.f32.mrf.mxu0  ;;  %v1666_v3 = vor.u32 1.1754944e-38, %v1665_v61  ;;  %vm1664_vm9 = vcmp.eq.f32.partialorder %v1663_v35, 8.507059e+37 }
 0x482   : > { %v1642_v23 = vmul.f32 %v2285_v9, %v1641_v17  ;;  %v1537_v25 = vadd.f32 %v3222_v38, %v1536_v21 }
 0x484   : > { %v2287_v56 = vpop.eup %2286  ;;  %v1643_v27 = vadd.f32 %v2285_v9, %v1642_v23  ;;  %v2071_v10 = vmul.f32 -1.442695, %v1537_v25  ;;  %v911_v25 = vld [vmem:[#allocation6 + $0x38] sm:$0xff] }
 0x485   : > { %v2289_v29 = vpop.eup %2288  ;;  %v1625_v31 = vadd.f32 1.0, %v2287_v56  ;;  %v990_v56 = vpop.f32.mrf.mxu1 }
 0x486   : > { %v1647_v42 = vsel %vm1646_vm4, %v2285_v9, %v1643_v27  ;;  %v1655_v55 = vmul.f32 %v2289_v29, %v1624_v28  ;;  %2290 = vpow2.f32 %v2071_v10  ;;  %vm1660_vm6 = vweird.f32 %v2289_v29 }
 0x487   : > { %v1652_v32 = vsel %vm1649_vm5, %v1651_v63, %v1647_v42  ;;  %2292 = vrcp.f32 %v1625_v31  ;;  %vm1661_vm8 = vmor %vm1659_vm7, %vm1660_vm6  ;;  %v1680_v51 = vand.u32 2147483648, %v1625_v31  ;;  %v1678_v44 = vand.u32 2147483647, %v1625_v31 }
 0x488   : > { %1879 = vst [vmem:[%s2950_s30] sm:$0xff] %v1652_v32  ;;  %v1656_v54 = vsub.f32 1.0, %v1655_v55  ;;  %vm1674_vm11 = vweird.f32 %v1625_v31 }
 0x489   : > { %v1539_v39 = vpop.f32.mrf.mxu0  ;;  %v1681_v62 = vor.u32 1.1754944e-38, %v1680_v51  ;;  %vm1679_vm13 = vcmp.eq.f32.partialorder %v1678_v44, 8.507059e+37 }
 0x48a   : > { %v1657_v33 = vmul.f32 %v2289_v29, %v1656_v54  ;;  %v1540_v8 = vadd.f32 %v3222_v38, %v1539_v39 }
 0x48c   : > { %v2291_v4 = vpop.eup %2290  ;;  %v1658_v49 = vadd.f32 %v2289_v29, %v1657_v33  ;;  %v2072_v57 = vmul.f32 -1.442695, %v1540_v8  ;;  %v912_v8 = vld [vmem:[#allocation6 + $0x40] sm:$0xff] }
 0x48d   : > { %v2293_v2 = vpop.eup %2292  ;;  %v1626_v46 = vadd.f32 1.0, %v2291_v4  ;;  %v993_v4 = vpop.f32.mrf.mxu1 }
 0x48e   : > { %v1662_v52 = vsel %vm1661_vm8, %v2289_v29, %v1658_v49  ;;  %v1670_v11 = vmul.f32 %v2293_v2, %v1625_v31  ;;  %2294 = vpow2.f32 %v2072_v57  ;;  %vm1675_vm10 = vweird.f32 %v2293_v2 }
 0x48f   : > { %v1667_v40 = vsel %vm1664_vm9, %v1666_v3, %v1662_v52  ;;  %2296 = vrcp.f32 %v1626_v46  ;;  %vm1676_vm12 = vmor %vm1674_vm11, %vm1675_vm10  ;;  %v1695_v22 = vand.u32 2147483648, %v1626_v46  ;;  %v1693_v28 = vand.u32 2147483647, %v1626_v46 }
 0x490   : > { %1880 = vst [vmem:[%s2950_s30 + $0x8] sm:$0xff] %v1667_v40  ;;  %v1671_v41 = vsub.f32 1.0, %v1670_v11  ;;  %vm1689_vm15 = vweird.f32 %v1626_v46  ;;  %v1024_v29 = vadd.f32 %v990_v56, %v911_v25 }
 0x491   : > { %v1542_v14 = vpop.f32.mrf.mxu0  ;;  %v1696_v47 = vor.u32 1.1754944e-38, %v1695_v22  ;;  %vm1694_vm1 = vcmp.eq.f32.partialorder %v1693_v28, 8.507059e+37 }
 0x492   : > { %v1672_v5 = vmul.f32 %v2293_v2, %v1671_v41  ;;  %v1543_v15 = vadd.f32 %v3222_v38, %v1542_v14  ;;  %1040 = vst [vmem:[#allocation6 + $0x38] sm:$0xff] %v1024_v29 }
 0x494   : > { %v2295_v12 = vpop.eup %2294  ;;  %v1673_v34 = vadd.f32 %v2293_v2, %v1672_v5  ;;  %v2073_v36 = vmul.f32 -1.442695, %v1543_v15  ;;  %v913_v15 = vld [vmem:[#allocation6 + $0x48] sm:$0xff] }
 0x495   : > { %v2297_v6 = vpop.eup %2296  ;;  %v1627_v37 = vadd.f32 1.0, %v2295_v12  ;;  %v996_v12 = vpop.f32.mrf.mxu1 }
 0x496   : > { %v1677_v16 = vsel %vm1676_vm12, %v2293_v2, %v1673_v34  ;;  %v1685_v50 = vmul.f32 %v2297_v6, %v1626_v46  ;;  %2298 = vpow2.f32 %v2073_v36  ;;  %vm1690_vm14 = vweird.f32 %v2297_v6 }
 0x497   : > { %v1682_v0 = vsel %vm1679_vm13, %v1681_v62, %v1677_v16  ;;  %2300 = vrcp.f32 %v1627_v37  ;;  %vm1691_vm0 = vmor %vm1689_vm15, %vm1690_vm14  ;;  %v1710_v63 = vand.u32 2147483648, %v1627_v37  ;;  %v1708_v55 = vand.u32 2147483647, %v1627_v37 }
 0x498   : > { %1881 = vst [vmem:[%s2950_s30 + $0x10] sm:$0xff] %v1682_v0  ;;  %v1686_v43 = vsub.f32 1.0, %v1685_v50  ;;  %vm1704_vm3 = vweird.f32 %v1627_v37  ;;  %v1025_v2 = vadd.f32 %v993_v4, %v912_v8 }
 0x499   : > { %v1545_v24 = vpop.f32.mrf.mxu0  ;;  %v1711_v61 = vor.u32 1.1754944e-38, %v1710_v63  ;;  %vm1709_vm5 = vcmp.eq.f32.partialorder %v1708_v55, 8.507059e+37 }
 0x49a   : > { %v1687_v9 = vmul.f32 %v2297_v6, %v1686_v43  ;;  %v1546_v26 = vadd.f32 %v3222_v38, %v1545_v24  ;;  %1041 = vst [vmem:[#allocation6 + $0x40] sm:$0xff] %v1025_v2 }
 0x49c   : > { %v2299_v30 = vpop.eup %2298  ;;  %v1688_v59 = vadd.f32 %v2297_v6, %v1687_v9  ;;  %v2074_v17 = vmul.f32 -1.442695, %v1546_v26  ;;  %v914_v26 = vld [vmem:[#allocation6 + $0x50] sm:$0xff] }
 0x49d   : > { %v2301_v19 = vpop.eup %2300  ;;  %v1628_v21 = vadd.f32 1.0, %v2299_v30  ;;  %v999_v30 = vpop.f32.mrf.mxu1 }
 0x49e   : > { %v1692_v23 = vsel %vm1691_vm0, %v2297_v6, %v1688_v59  ;;  %v1700_v13 = vmul.f32 %v2301_v19, %v1627_v37  ;;  %2302 = vpow2.f32 %v2074_v17  ;;  %vm1705_vm2 = vweird.f32 %v2301_v19 }
 0x49f   : > { %v1697_v27 = vsel %vm1694_vm1, %v1696_v47, %v1692_v23  ;;  %2304 = vrcp.f32 %v1628_v21  ;;  %vm1706_vm4 = vmor %vm1704_vm3, %vm1705_vm2  ;;  %v1725_v3 = vand.u32 2147483648, %v1628_v21  ;;  %v1723_v11 = vand.u32 2147483647, %v1628_v21 }
 0x4a0   : > { %1882 = vst [vmem:[%s2950_s30 + $0x18] sm:$0xff] %v1697_v27  ;;  %v1701_v10 = vsub.f32 1.0, %v1700_v13  ;;  %vm1719_vm7 = vweird.f32 %v1628_v21  ;;  %v1026_v6 = vadd.f32 %v996_v12, %v913_v15 }
 0x4a1   : > { %v1548_v31 = vpop.f32.mrf.mxu0  ;;  %v1726_v51 = vor.u32 1.1754944e-38, %v1725_v3  ;;  %vm1724_vm9 = vcmp.eq.f32.partialorder %v1723_v11, 8.507059e+37 }
 0x4a2   : > { %v1702_v42 = vmul.f32 %v2301_v19, %v1701_v10  ;;  %v1549_v53 = vadd.f32 %v3222_v38, %v1548_v31  ;;  %1042 = vst [vmem:[#allocation6 + $0x48] sm:$0xff] %v1026_v6 }
 0x4a4   : > { %v2303_v60 = vpop.eup %2302  ;;  %v1703_v32 = vadd.f32 %v2301_v19, %v1702_v42  ;;  %v2075_v54 = vmul.f32 -1.442695, %v1549_v53  ;;  %v915_v53 = vld [vmem:[#allocation6 + $0x58] sm:$0xff] }
 0x4a5   : > { %v2305_v48 = vpop.eup %2304  ;;  %v1629_v39 = vadd.f32 1.0, %v2303_v60  ;;  %v1002_v60 = vpop.f32.mrf.mxu1 }
 0x4a6   : > { %v1707_v33 = vsel %vm1706_vm4, %v2301_v19, %v1703_v32  ;;  %v1715_v35 = vmul.f32 %v2305_v48, %v1628_v21  ;;  %2306 = vpow2.f32 %v2075_v54  ;;  %vm1720_vm6 = vweird.f32 %v2305_v48 }
 0x4a7   : > { %v1712_v49 = vsel %vm1709_vm5, %v1711_v61, %v1707_v33  ;;  %2308 = vrcp.f32 %v1629_v39  ;;  %vm1721_vm8 = vmor %vm1719_vm7, %vm1720_vm6  ;;  %v1740_v62 = vand.u32 2147483648, %v1629_v39  ;;  %v1738_v50 = vand.u32 2147483647, %v1629_v39 }
 0x4a8   : > { %1883 = vst [vmem:[%s2950_s30 + $0x20] sm:$0xff] %v1712_v49  ;;  %v1716_v57 = vsub.f32 1.0, %v1715_v35  ;;  %vm1734_vm11 = vweird.f32 %v1629_v39  ;;  %v1027_v19 = vadd.f32 %v999_v30, %v914_v26 }
 0x4a9   : > { %v1551_v46 = vpop.f32.mrf.mxu0  ;;  %v1741_v22 = vor.u32 1.1754944e-38, %v1740_v62  ;;  %vm1739_vm13 = vcmp.eq.f32.partialorder %v1738_v50, 8.507059e+37 }
 0x4aa   : > { %v1717_v52 = vmul.f32 %v2305_v48, %v1716_v57  ;;  %v1552_v45 = vadd.f32 %v3222_v38, %v1551_v46  ;;  %1043 = vst [vmem:[#allocation6 + $0x50] sm:$0xff] %v1027_v19 }
 0x4ac   : > { %v2307_v1 = vpop.eup %2306  ;;  %v1718_v40 = vadd.f32 %v2305_v48, %v1717_v52  ;;  %v2076_v41 = vmul.f32 -1.442695, %v1552_v45  ;;  %v916_v45 = vld [vmem:[#allocation6 + $0x60] sm:$0xff] }
 0x4ad   : > { %v2309_v7 = vpop.eup %2308  ;;  %v1630_v14 = vadd.f32 1.0, %v2307_v1  ;;  %v1005_v1 = vpop.f32.mrf.mxu1 }
 0x4ae   : > { %v1722_v5 = vsel %vm1721_vm8, %v2305_v48, %v1718_v40  ;;  %v1730_v44 = vmul.f32 %v2309_v7, %v1629_v39  ;;  %2310 = vpow2.f32 %v2076_v41  ;;  %vm1735_vm10 = vweird.f32 %v2309_v7 }
 0x4af   : > { %v1727_v34 = vsel %vm1724_vm9, %v1726_v51, %v1722_v5  ;;  %2312 = vrcp.f32 %v1630_v14  ;;  %vm1736_vm12 = vmor %vm1734_vm11, %vm1735_vm10  ;;  %v1755_v47 = vand.u32 2147483648, %v1630_v14  ;;  %v1753_v13 = vand.u32 2147483647, %v1630_v14 }
 0x4b0   : > { %1884 = vst [vmem:[%s2950_s30 + $0x28] sm:$0xff] %v1727_v34  ;;  %v1731_v36 = vsub.f32 1.0, %v1730_v44  ;;  %vm1749_vm15 = vweird.f32 %v1630_v14  ;;  %v1028_v48 = vadd.f32 %v1002_v60, %v915_v53 }
 0x4b1   : > { %v1554_v37 = vpop.f32.mrf.mxu0  ;;  %v1756_v63 = vor.u32 1.1754944e-38, %v1755_v47  ;;  %vm1754_vm1 = vcmp.eq.f32.partialorder %v1753_v13, 8.507059e+37 }
 0x4b2   : > { %v1732_v16 = vmul.f32 %v2309_v7, %v1731_v36  ;;  %v1555_v58 = vadd.f32 %v3222_v38, %v1554_v37  ;;  %1044 = vst [vmem:[#allocation6 + $0x58] sm:$0xff] %v1028_v48 }
 0x4b4   : > { %v2311_v18 = vpop.eup %2310  ;;  %v1733_v0 = vadd.f32 %v2309_v7, %v1732_v16  ;;  %v2077_v43 = vmul.f32 -1.442695, %v1555_v58  ;;  %v917_v58 = vld [vmem:[#allocation6 + $0x68] sm:$0xff] }
 0x4b5   : > { %v2313_v20 = vpop.eup %2312  ;;  %v1631_v24 = vadd.f32 1.0, %v2311_v18  ;;  %v1008_v18 = vpop.f32.mrf.mxu1 }
 0x4b6   : > { %v1737_v9 = vsel %vm1736_vm12, %v2309_v7, %v1733_v0  ;;  %v1745_v28 = vmul.f32 %v2313_v20, %v1630_v14  ;;  %2314 = vpow2.f32 %v2077_v43  ;;  %vm1750_vm14 = vweird.f32 %v2313_v20 }
 0x4b7   : > { %v1742_v59 = vsel %vm1739_vm13, %v1741_v22, %v1737_v9  ;;  %2316 = vrcp.f32 %v1631_v24  ;;  %vm1751_vm0 = vmor %vm1749_vm15, %vm1750_vm14  ;;  %v1770_v61 = vand.u32 2147483648, %v1631_v24  ;;  %v1768_v35 = vand.u32 2147483647, %v1631_v24 }
 0x4b8   : > { %1885 = vst [vmem:[%s2950_s30 + $0x30] sm:$0xff] %v1742_v59  ;;  %v1746_v17 = vsub.f32 1.0, %v1745_v28  ;;  %vm1764_vm3 = vweird.f32 %v1631_v24  ;;  %v1029_v7 = vadd.f32 %v1005_v1, %v916_v45 }
 0x4b9   : > { %v1557_v21 = vpop.f32.mrf.mxu0  ;;  %v1771_v3 = vor.u32 1.1754944e-38, %v1770_v61  ;;  %vm1769_vm5 = vcmp.eq.f32.partialorder %v1768_v35, 8.507059e+37 }
 0x4ba   : > { %v1747_v23 = vmul.f32 %v2313_v20, %v1746_v17  ;;  %v1558_v25 = vadd.f32 %v3222_v38, %v1557_v21  ;;  %1045 = vst [vmem:[#allocation6 + $0x60] sm:$0xff] %v1029_v7 }
 0x4bc   : > { %v2315_v56 = vpop.eup %2314  ;;  %v1748_v27 = vadd.f32 %v2313_v20, %v1747_v23  ;;  %v2078_v10 = vmul.f32 -1.442695, %v1558_v25  ;;  %v918_v25 = vld [vmem:[#allocation6 + $0x70] sm:$0xff] }
 0x4bd   : > { %v2317_v29 = vpop.eup %2316  ;;  %v1632_v31 = vadd.f32 1.0, %v2315_v56  ;;  %v1011_v56 = vpop.f32.mrf.mxu1 }
 0x4be   : > { %v1752_v42 = vsel %vm1751_vm0, %v2313_v20, %v1748_v27  ;;  %v1760_v55 = vmul.f32 %v2317_v29, %v1631_v24  ;;  %2318 = vpow2.f32 %v2078_v10  ;;  %vm1765_vm2 = vweird.f32 %v2317_v29 }
 0x4bf   : > { %v1757_v32 = vsel %vm1754_vm1, %v1756_v63, %v1752_v42  ;;  %2320 = vrcp.f32 %v1632_v31  ;;  %vm1766_vm4 = vmor %vm1764_vm3, %vm1765_vm2  ;;  %v1785_v51 = vand.u32 2147483648, %v1632_v31  ;;  %v1783_v44 = vand.u32 2147483647, %v1632_v31 }
 0x4c0   : > { %1886 = vst [vmem:[%s2950_s30 + $0x38] sm:$0xff] %v1757_v32  ;;  %v1761_v54 = vsub.f32 1.0, %v1760_v55  ;;  %vm1779_vm7 = vweird.f32 %v1632_v31  ;;  %v1030_v20 = vadd.f32 %v1008_v18, %v917_v58 }
 0x4c1   : > { %v1560_v39 = vpop.f32.mrf.mxu0  ;;  %v1786_v62 = vor.u32 1.1754944e-38, %v1785_v51  ;;  %vm1784_vm9 = vcmp.eq.f32.partialorder %v1783_v44, 8.507059e+37 }
 0x4c2   : > { %v1762_v33 = vmul.f32 %v2317_v29, %v1761_v54  ;;  %v1561_v8 = vadd.f32 %v3222_v38, %v1560_v39  ;;  %1046 = vst [vmem:[#allocation6 + $0x68] sm:$0xff] %v1030_v20 }
 0x4c4   : > { %v2319_v4 = vpop.eup %2318  ;;  %v1763_v49 = vadd.f32 %v2317_v29, %v1762_v33  ;;  %v2079_v57 = vmul.f32 -1.442695, %v1561_v8  ;;  %v919_v8 = vld [vmem:[#allocation6 + $0x78] sm:$0xff] }
 0x4c5   : > { %v2321_v2 = vpop.eup %2320  ;;  %v1633_v46 = vadd.f32 1.0, %v2319_v4  ;;  %v1014_v4 = vpop.f32.mrf.mxu1 }
 0x4c6   : > { %v1767_v52 = vsel %vm1766_vm4, %v2317_v29, %v1763_v49  ;;  %v1775_v11 = vmul.f32 %v2321_v2, %v1632_v31  ;;  %2322 = vpow2.f32 %v2079_v57  ;;  %vm1780_vm6 = vweird.f32 %v2321_v2 }
 0x4c7   : > { %v1772_v40 = vsel %vm1769_vm5, %v1771_v3, %v1767_v52  ;;  %2324 = vrcp.f32 %v1633_v46  ;;  %vm1781_vm8 = vmor %vm1779_vm7, %vm1780_vm6  ;;  %v1800_v22 = vand.u32 2147483648, %v1633_v46  ;;  %v1798_v28 = vand.u32 2147483647, %v1633_v46 }
 0x4c8   : > { %1887 = vst [vmem:[%s2950_s30 + $0x40] sm:$0xff] %v1772_v40  ;;  %v1776_v41 = vsub.f32 1.0, %v1775_v11  ;;  %vm1794_vm11 = vweird.f32 %v1633_v46  ;;  %v1031_v29 = vadd.f32 %v1011_v56, %v918_v25 }
 0x4c9   : > { %v1563_v14 = vpop.f32.mrf.mxu0  ;;  %v1801_v47 = vor.u32 1.1754944e-38, %v1800_v22  ;;  %vm1799_vm13 = vcmp.eq.f32.partialorder %v1798_v28, 8.507059e+37 }
 0x4ca   : > { %v1777_v5 = vmul.f32 %v2321_v2, %v1776_v41  ;;  %v1564_v15 = vadd.f32 %v3222_v38, %v1563_v14  ;;  %1047 = vst [vmem:[#allocation6 + $0x70] sm:$0xff] %v1031_v29 }
 0x4cc   : > { %v2323_v12 = vpop.eup %2322  ;;  %v1778_v34 = vadd.f32 %v2321_v2, %v1777_v5  ;;  %v2080_v36 = vmul.f32 -1.442695, %v1564_v15 }
 0x4cd   : > { %v2325_v6 = vpop.eup %2324  ;;  %v1634_v37 = vadd.f32 1.0, %v2323_v12 }
 0x4ce   : > { %v1782_v16 = vsel %vm1781_vm8, %v2321_v2, %v1778_v34  ;;  %v1790_v50 = vmul.f32 %v2325_v6, %v1633_v46  ;;  %2326 = vpow2.f32 %v2080_v36  ;;  %vm1795_vm10 = vweird.f32 %v2325_v6 }
 0x4cf   : > { %v1787_v0 = vsel %vm1784_vm9, %v1786_v62, %v1782_v16  ;;  %2328 = vrcp.f32 %v1634_v37  ;;  %vm1796_vm12 = vmor %vm1794_vm11, %vm1795_vm10  ;;  %v1815_v63 = vand.u32 2147483648, %v1634_v37  ;;  %v1813_v55 = vand.u32 2147483647, %v1634_v37 }
 0x4d0   : > { %1888 = vst [vmem:[%s2950_s30 + $0x48] sm:$0xff] %v1787_v0  ;;  %v1791_v43 = vsub.f32 1.0, %v1790_v50  ;;  %vm1809_vm15 = vweird.f32 %v1634_v37  ;;  %v1032_v2 = vadd.f32 %v1014_v4, %v919_v8 }
 0x4d1   : > { %v1566_v24 = vpop.f32.mrf.mxu0  ;;  %v1816_v61 = vor.u32 1.1754944e-38, %v1815_v63  ;;  %vm1814_vm1 = vcmp.eq.f32.partialorder %v1813_v55, 8.507059e+37 }
 0x4d2   : > { %v1792_v9 = vmul.f32 %v2325_v6, %v1791_v43  ;;  %v1567_v26 = vadd.f32 %v3222_v38, %v1566_v24  ;;  %1048 = vst [vmem:[#allocation6 + $0x78] sm:$0xff] %v1032_v2 }
 0x4d3   : > { %2157 = dma.vmem_to_hbm [thread:$0]  (%p3346_p7), %s1923_s21, 2048, %s1925_s26, [#allocation7], %s2478_s18, %s2478_s18, %s2479_s13  }
 0x4d4   : > { %v2327_v30 = vpop.eup %2326  ;;  %v1793_v59 = vadd.f32 %v2325_v6, %v1792_v9  ;;  %v2081_v17 = vmul.f32 -1.442695, %v1567_v26  ;;  %s1896_s21 = scalar_lea.sflag [#allocation4], %s2634_s29 }
 0x4d5   : > { %v2329_v19 = vpop.eup %2328  ;;  %v3248_v21 = vadd.f32 1.0, %v2327_v30 }
 0x4d6   : > { %v1797_v23 = vsel %vm1796_vm12, %v2325_v6, %v1793_v59  ;;  %v1805_v13 = vmul.f32 %v2329_v19, %v1634_v37  ;;  %2330 = vpow2.f32 %v2081_v17  ;;  %vm1810_vm14 = vweird.f32 %v2329_v19 }
 0x4d7   : > { %v1802_v27 = vsel %vm1799_vm13, %v1801_v47, %v1797_v23  ;;  %2332 = vrcp.f32 %v3248_v21  ;;  %vm1811_vm0 = vmor %vm1809_vm15, %vm1810_vm14  ;;  %v1830_v3 = vand.u32 2147483648, %v3248_v21  ;;  %v1828_v11 = vand.u32 2147483647, %v3248_v21 }
 0x4d8   : > { %1889 = vst [vmem:[%s2950_s30 + $0x50] sm:$0xff] %v1802_v27  ;;  %v1806_v10 = vsub.f32 1.0, %v1805_v13  ;;  %vm1824_vm3 = vweird.f32 %v3248_v21 }
 0x4d9   : > { %v1569_v31 = vpop.f32.mrf.mxu0  ;;  %v1831_v51 = vor.u32 1.1754944e-38, %v1830_v3  ;;  %vm1829_vm5 = vcmp.eq.f32.partialorder %v1828_v11, 8.507059e+37 }
 0x4da   : > { %v1807_v42 = vmul.f32 %v2329_v19, %v1806_v10  ;;  %v1570_v53 = vadd.f32 %v3222_v38, %v1569_v31 }
 0x4dc   : > { %v2331_v60 = vpop.eup %2330  ;;  %v1808_v32 = vadd.f32 %v2329_v19, %v1807_v42  ;;  %v2082_v54 = vmul.f32 -1.442695, %v1570_v53 }
 0x4dd   : > { %v2333_v48 = vpop.eup %2332  ;;  %v1636_v39 = vadd.f32 1.0, %v2331_v60 }
 0x4de   : > { %v1812_v33 = vsel %vm1811_vm0, %v2329_v19, %v1808_v32  ;;  %v1820_v35 = vmul.f32 %v2333_v48, %v3248_v21  ;;  %2334 = vpow2.f32 %v2082_v54  ;;  %vm1825_vm2 = vweird.f32 %v2333_v48 }
 0x4df   : > { %v1817_v49 = vsel %vm1814_vm1, %v1816_v61, %v1812_v33  ;;  %2336 = vrcp.f32 %v1636_v39  ;;  %vm1826_vm4 = vmor %vm1824_vm3, %vm1825_vm2  ;;  %v1845_v12 = vand.u32 2147483648, %v1636_v39  ;;  %v1843_v36 = vand.u32 2147483647, %v1636_v39 }
 0x4e0   : > { %1890 = vst [vmem:[%s2950_s30 + $0x58] sm:$0xff] %v1817_v49  ;;  %v1821_v57 = vsub.f32 1.0, %v1820_v35  ;;  %vm1839_vm7 = vweird.f32 %v1636_v39 }
 0x4e1   : > { %v1572_v46 = vpop.f32.mrf.mxu0  ;;  %v1846_v16 = vor.u32 1.1754944e-38, %v1845_v12  ;;  %vm1844_vm9 = vcmp.eq.f32.partialorder %v1843_v36, 8.507059e+37 }
 0x4e2   : > { %v1822_v52 = vmul.f32 %v2333_v48, %v1821_v57  ;;  %v1573_v45 = vadd.f32 %v3222_v38, %v1572_v46 }
 0x4e4   : > { %v2335_v1 = vpop.eup %2334  ;;  %v1823_v40 = vadd.f32 %v2333_v48, %v1822_v52  ;;  %v2083_v41 = vmul.f32 -1.442695, %v1573_v45 }
 0x4e5   : > { %v2337_v7 = vpop.eup %2336  ;;  %v1637_v14 = vadd.f32 1.0, %v2335_v1 }
 0x4e6   : > { %v1827_v5 = vsel %vm1826_vm4, %v2333_v48, %v1823_v40  ;;  %v1835_v38 = vmul.f32 %v2337_v7, %v1636_v39  ;;  %2338 = vpow2.f32 %v2083_v41  ;;  %vm1840_vm6 = vweird.f32 %v2337_v7 }
 0x4e7   : > { %v1832_v44 = vsel %vm1829_vm5, %v1831_v51, %v1827_v5  ;;  %2340 = vrcp.f32 %v1637_v14  ;;  %vm1841_vm8 = vmor %vm1839_vm7, %vm1840_vm6  ;;  %v1860_v20 = vand.u32 2147483648, %v1637_v14  ;;  %v1858_v24 = vand.u32 2147483647, %v1637_v14 }
 0x4e8   : > { %1891 = vst [vmem:[%s2950_s30 + $0x60] sm:$0xff] %v1832_v44  ;;  %v1836_v15 = vsub.f32 1.0, %v1835_v38  ;;  %vm1854_vm11 = vweird.f32 %v1637_v14 }
 0x4e9   : > { %v1861_v26 = vor.u32 1.1754944e-38, %v1860_v20  ;;  %vm1859_vm13 = vcmp.eq.f32.partialorder %v1858_v24, 8.507059e+37 }
 0x4ea   : > { %v1837_v34 = vmul.f32 %v2337_v7, %v1836_v15 }
 0x4ec   : > { %v2339_v6 = vpop.eup %2338  ;;  %v1838_v62 = vadd.f32 %v2337_v7, %v1837_v34 }
 0x4ed   : > { %v2341_v37 = vpop.eup %2340  ;;  %v1638_v50 = vadd.f32 1.0, %v2339_v6 }
 0x4ee   : > { %v1842_v58 = vsel %vm1841_vm8, %v2337_v7, %v1838_v62  ;;  %v1850_v18 = vmul.f32 %v2341_v37, %v1637_v14  ;;  %vm1855_vm10 = vweird.f32 %v2341_v37 }
 0x4ef   : > { %v1847_v0 = vsel %vm1844_vm9, %v1846_v16, %v1842_v58  ;;  %2342 = vrcp.f32 %v1638_v50  ;;  %vm1856_vm12 = vmor %vm1854_vm11, %vm1855_vm10  ;;  %v1875_v47 = vand.u32 2147483648, %v1638_v50  ;;  %v1873_v23 = vand.u32 2147483647, %v1638_v50 }
 0x4f0   : > { %1892 = vst [vmem:[%s2950_s30 + $0x68] sm:$0xff] %v1847_v0  ;;  %v1851_v43 = vsub.f32 1.0, %v1850_v18  ;;  %vm1869_vm15 = vweird.f32 %v1638_v50 }
 0x4f1   : > { %v1876_v25 = vor.u32 1.1754944e-38, %v1875_v47  ;;  %vm1874_vm1 = vcmp.eq.f32.partialorder %v1873_v23, 8.507059e+37 }
 0x4f2   : > { %v1852_v22 = vmul.f32 %v2341_v37, %v1851_v43 }
 0x4f4   : > { %v1853_v9 = vadd.f32 %v2341_v37, %v1852_v22 }
 0x4f5   : > { %v2343_v28 = vpop.eup %2342 }
 0x4f6   : > { %v1857_v30 = vsel %vm1856_vm12, %v2341_v37, %v1853_v9  ;;  %v1865_v59 = vmul.f32 %v2343_v28, %v1638_v50  ;;  %vm1870_vm14 = vweird.f32 %v2343_v28 }
 0x4f7   : > { %v1862_v17 = vsel %vm1859_vm13, %v1861_v26, %v1857_v30  ;;  %vm1871_vm0 = vmor %vm1869_vm15, %vm1870_vm14 }
 0x4f8   : > { %1893 = vst [vmem:[%s2950_s30 + $0x70] sm:$0xff] %v1862_v17  ;;  %v1866_v19 = vsub.f32 1.0, %v1865_v59 }
 0x4fa   : > { %v1867_v21 = vmul.f32 %v2343_v28, %v1866_v19 }
 0x4fc   : > { %v1868_v13 = vadd.f32 %v2343_v28, %v1867_v21 }
 0x4fe   : > { %v1872_v56 = vsel %vm1871_vm0, %v2343_v28, %v1868_v13 }
 0x4ff   : > { %v1877_v27 = vsel %vm1874_vm1, %v1876_v25, %v1872_v56 }
 0x500   : > { %1894 = vst [vmem:[%s2950_s30 + $0x78] sm:$0xff] %v1877_v27 }
 0x501   : > { %2429 = shalt.err (!%p2426_p8)
}
 0x502   : > { %2155 = dma.vmem_to_hbm [thread:$0]  (%p2598_p11), %s1909_s17, 2048, %s1911_s28, %s1896_s21, %s2478_s18, %s2478_s18, %s2479_s13  }
 0x503   : > { %p3348_p5 = pmov %p3346_p7 }
 0x505   : > { %2451 = dma.done.wait (%p3348_p5), [#allocation7], 2048   ;;  %p3349_p10 = pmov %p3348_p5 }
 0x507   : > { %2453 = vsyncadd (%p3349_p10), [#allocation7], 4294965248 }
 0x508 PF: > { %s3350_s29 = sld [smem:[#allocation11_spill]]  ;;  %p3352_p2 = scmp.ge.s32.totalorder %s2472_s24, 2 }
 0x50a   : > { %p2166_p6 = pnand %p3352_p2, %p2602_p12 }
 0x50c   : > { %p2167_p7 = pneg %p2166_p6 }
 0x50e   : > { %s1944_s23 = sand.u32 1, %s3350_s29  }
 0x50f   : > { %s1945_s16 = scalar_lea.sflag [#allocation4], %s1944_s23 }
 0x510   : > { %2455 = dma.done.wait (%p2167_p7), %s1945_s16, 2048  }
 0x511   : > { %2457 = vsyncadd (%p2167_p7), %s1945_s16, 4294965248  ;;  %s3353_s24 = sld [smem:[#allocation13_spill]]  ;;  %s3356_s21 = smov %s2464_s22 }
 0x512   : > { %s3354_s18 = sld [smem:[#allocation12_spill]] }
 0x513   : > { %s3355_s23 = sld [smem:[#allocation14_spill]] }
 0x517   : > { %p27_p11 = scmp.ge.s32.totalorder %s3353_s24, 4  }
 0x518   : > { %s3357_s22 = smov %s3354_s18 }
 0x519   :  { %29 = sbr.rel (!%p27_p11) target bundleno = 6 (0x6), region = 121 }
 0x51e   :  { %1951 = vsyncpa [#allocation3], 1 }
 0x51f   :  { %1953 = vsyncpa [#allocation3 + $0x1], 1 }
 0x520   :  { %1954 = vsyncpa [#allocation4], 1 }
 0x521   :  { %1956 = vsyncpa [#allocation4 + $0x1], 1 }
 0x522   :  { %1957 = vsyncpa [#allocation7], 1 }

</bundles_post_ra>
